<compile_context>
chip_gen: v7x
topology: tpu7x:2x2x1
jax: 0.10.0
libtpu: 0.0.40
codegen_flags: <defaults>
</compile_context>

<pallas_src>
import functools
import math

import jax
import jax.numpy as jnp
from jax.experimental import pallas as pl
from jax.experimental.pallas import tpu as pltpu

# ----------------------------- configuration -------------------------------
IMG = 32          # image size        (real model: 224)
PATCH = 16        # patch size        (real model: 16)
C_IN = 3          # input channels
E = 128           # hidden dim        (real model: 768)
HEADS = 4         # attention heads   (real model: 12)
HEAD_DIM = E // HEADS
MLP = 256         # mlp dim           (real model: 3072)
LAYERS = 2        # encoder layers    (real model: 12)
N_CLASSES = 18    # from nn.Linear(768, 18)
HEAD_PAD = 128    # classifier output padded to a full lane group
N_PATCH = (IMG // PATCH) ** 2
SEQ = N_PATCH + 1
LN_EPS = 1e-6     # torchvision ViT LayerNorm eps


# ------------------------------- helpers ------------------------------------
def _row_tile(m, target=256):
    """Largest row tile (multiple of 8, <= target) that divides m, else full."""
    if m <= target or m % 8 != 0:
        return m
    for t in (target, 128, 64, 32, 16, 8):
        if m % t == 0:
            return t
    return m


def _erf(x):
    # Abramowitz & Stegun 7.1.26 rational approximation, |err| < 1.5e-7 (f32);
    # exp goes to the EUP, the polynomial is VALU filler under the MXU.
    a1, a2, a3, a4, a5 = (0.254829592, -0.284496736, 1.421413741,
                          -1.453152027, 1.061405429)
    p = 0.3275911
    sgn = jnp.where(x >= 0.0, 1.0, -1.0)
    z = jnp.abs(x)
    t = 1.0 / (1.0 + p * z)
    poly = ((((a5 * t + a4) * t + a3) * t + a2) * t + a1) * t
    return sgn * (1.0 - poly * jnp.exp(-z * z))


def _gelu_exact(x):
    # torch.nn.GELU(approximate='none'): 0.5 * x * (1 + erf(x / sqrt(2)))
    return 0.5 * x * (1.0 + _erf(x * 0.7071067811865476))


def _ln(x, g, b, eps):
    mu = jnp.mean(x, axis=-1, keepdims=True)
    var = jnp.mean(jnp.square(x - mu), axis=-1, keepdims=True)
    return (x - mu) * jax.lax.rsqrt(var + eps) * g + b


# ------------------------------ Pallas kernels ------------------------------
def _linear_kernel(x_ref, w_ref, b_ref, o_ref, *, act):
    x = x_ref[...].astype(jnp.bfloat16)
    y = jnp.dot(x, w_ref[...], preferred_element_type=jnp.float32) + b_ref[...]
    if act == "gelu":
        y = _gelu_exact(y)
    o_ref[...] = y


def _ln_linear_kernel(x_ref, g_ref, bln_ref, w_ref, b_ref, o_ref, *, act, eps):
    y = _ln(x_ref[...], g_ref[...], bln_ref[...], eps)          # f32 stats
    y = jnp.dot(y.astype(jnp.bfloat16), w_ref[...],
                preferred_element_type=jnp.float32) + b_ref[...]
    if act == "gelu":
        y = _gelu_exact(y)
    o_ref[...] = y


def _linear_res_kernel(x_ref, w_ref, b_ref, r_ref, o_ref):
    x = x_ref[...].astype(jnp.bfloat16)
    o_ref[...] = (jnp.dot(x, w_ref[...], preferred_element_type=jnp.float32)
                  + b_ref[...] + r_ref[...])


def _ln_mlp_kernel(x_ref, g_ref, bln_ref, w1_ref, b1_ref, w2_ref, b2_ref,
                   o_ref, *, eps):
    # Full MLP block: LN -> fc1 -> GELU -> fc2 -> +residual, one HBM pass.
    x = x_ref[...]
    y = _ln(x, g_ref[...], bln_ref[...], eps)
    h = jnp.dot(y.astype(jnp.bfloat16), w1_ref[...],
                preferred_element_type=jnp.float32) + b1_ref[...]
    h = _gelu_exact(h)
    o_ref[...] = (jnp.dot(h.astype(jnp.bfloat16), w2_ref[...],
                          preferred_element_type=jnp.float32)
                  + b2_ref[...] + x)


def _attn_kernel(qkv_ref, o_ref, *, heads, scale):
    # One batch element per grid step; all heads computed here and written as
    # an already-merged lane-dense (S, E) slab.
    # TODO(synk): for the real S=197+ config, stream K/V tiles with an
    # online-softmax (flash-style) loop instead of the full (S, S) scores.
    qkv = qkv_ref[0]                              # (S, 3E) f32
    e = qkv.shape[-1] // 3
    dh = e // heads
    outs = []
    for h in range(heads):
        q = qkv[:, h * dh:(h + 1) * dh].astype(jnp.bfloat16)
        k = qkv[:, e + h * dh:e + (h + 1) * dh].astype(jnp.bfloat16)
        v = qkv[:, 2 * e + h * dh:2 * e + (h + 1) * dh].astype(jnp.bfloat16)
        sc = jax.lax.dot_general(q, k, (((1,), (1,)), ((), ())),
                                 preferred_element_type=jnp.float32) * scale
        m = jnp.max(sc, axis=-1, keepdims=True)
        p = jnp.exp(sc - m)                        # f32 softmax statistics
        l_inv = pl.reciprocal(jnp.sum(p, axis=-1, keepdims=True), approx=True)
        o = jnp.dot(p.astype(jnp.bfloat16), v,
                    preferred_element_type=jnp.float32)
        outs.append(o * l_inv)
    o_ref[0] = jnp.concatenate(outs, axis=-1)      # lane-dense (S, E) store


# ------------------------------ kernel wrappers -----------------------------
def linear(x, w, b, *, act=None, residual=None, ln=None, eps=LN_EPS):
    """y = [LN(x)] @ w + b [+ residual], row-tiled grid, bf16 MXU inputs."""
    m, k = x.shape
    n = w.shape[1]
    tm = _row_tile(m)
    grid = (m // tm,)
    cp = pltpu.CompilerParams(dimension_semantics=("parallel",))
    x_spec = pl.BlockSpec((tm, k), lambda i: (i, 0))
    w_spec = pl.BlockSpec((k, n), lambda i: (0, 0))
    bias_spec = pl.BlockSpec((1, n), lambda i: (0, 0))
    r_spec = pl.BlockSpec((tm, n), lambda i: (i, 0))
    o_spec = pl.BlockSpec((tm, n), lambda i: (i, 0))
    out_shape = jax.ShapeDtypeStruct((m, n), jnp.float32)
    b2 = b.reshape(1, n).astype(jnp.float32)
    # TODO(synk): at the real vit_b_16 sizes, additionally tile N/K with an
    # f32 accumulator scratch so weights are not fully VMEM-resident.

    if ln is not None:
        g2 = ln[0].reshape(1, k).astype(jnp.float32)
        be2 = ln[1].reshape(1, k).astype(jnp.float32)
        ln_spec = pl.BlockSpec((1, k), lambda i: (0, 0))
        return pl.pallas_call(
            functools.partial(_ln_linear_kernel, act=act, eps=eps),
            out_shape=out_shape, grid=grid,
            in_specs=[x_spec, ln_spec, ln_spec, w_spec, bias_spec],
            out_specs=o_spec, compiler_params=cp,
        )(x, g2, be2, w, b2)
    if residual is not None:
        return pl.pallas_call(
            _linear_res_kernel,
            out_shape=out_shape, grid=grid,
            in_specs=[x_spec, w_spec, bias_spec, r_spec],
            out_specs=o_spec, compiler_params=cp,
        )(x, w, b2, residual)
    return pl.pallas_call(
        functools.partial(_linear_kernel, act=act),
        out_shape=out_shape, grid=grid,
        in_specs=[x_spec, w_spec, bias_spec],
        out_specs=o_spec, compiler_params=cp,
    )(x, w, b2)


def mlp_block(x, g, bet, w1, b1, w2, b2, eps=LN_EPS):
    m, e = x.shape
    hdim = w1.shape[1]
    tm = _row_tile(m)
    grid = (m // tm,)
    x_spec = pl.BlockSpec((tm, e), lambda i: (i, 0))
    vec_e = pl.BlockSpec((1, e), lambda i: (0, 0))
    vec_h = pl.BlockSpec((1, hdim), lambda i: (0, 0))
    w1_spec = pl.BlockSpec((e, hdim), lambda i: (0, 0))
    w2_spec = pl.BlockSpec((hdim, e), lambda i: (0, 0))
    return pl.pallas_call(
        functools.partial(_ln_mlp_kernel, eps=eps),
        out_shape=jax.ShapeDtypeStruct((m, e), jnp.float32),
        grid=grid,
        in_specs=[x_spec, vec_e, vec_e, w1_spec, vec_h, w2_spec, vec_e],
        out_specs=x_spec,
        compiler_params=pltpu.CompilerParams(dimension_semantics=("parallel",)),
    )(x, g.reshape(1, e), bet.reshape(1, e), w1, b1.reshape(1, hdim),
      w2, b2.reshape(1, e))


def attention(qkv):
    # qkv: (B, S, 3E) fused projections; one grid step per batch element,
    # output already head-merged as (B, S, E).
    b, s, _ = qkv.shape
    scale = 1.0 / math.sqrt(HEAD_DIM)
    in_spec = pl.BlockSpec((1, s, 3 * E), lambda i: (i, 0, 0))
    out_spec = pl.BlockSpec((1, s, E), lambda i: (i, 0, 0))
    return pl.pallas_call(
        functools.partial(_attn_kernel, heads=HEADS, scale=scale),
        out_shape=jax.ShapeDtypeStruct((b, s, E), jnp.float32),
        grid=(b,),
        in_specs=[in_spec],
        out_specs=out_spec,
        compiler_params=pltpu.CompilerParams(dimension_semantics=("parallel",)),
    )(qkv)


# ------------------------------ model glue ----------------------------------
def vit_forward(params, x):
    b, c, hh, ww = x.shape
    nh, nw = hh // PATCH, ww // PATCH
    # conv_proj (kernel == stride == patch) expressed as a matmul over
    # flattened patches; patch vector ordering matches (C, kh, kw) of the
    # PyTorch conv weight.
    patches = (x.reshape(b, c, nh, PATCH, nw, PATCH)
                .transpose(0, 2, 4, 1, 3, 5)
                .reshape(b * nh * nw, c * PATCH * PATCH))
    tok = linear(patches, params["conv_w"], params["conv_b"])
    tok = tok.reshape(b, nh * nw, E)
    cls = jnp.broadcast_to(params["cls"], (b, 1, E))
    h = jnp.concatenate([cls, tok], axis=1) + params["pos"]     # (B, S, E)
    s = h.shape[1]

    for lyr in params["layers"]:
        # --- multi-head self-attention block (pre-LN, residual) ---
        x2 = h.reshape(b * s, E)
        qkv = linear(x2, lyr["wqkv"], lyr["bqkv"],
                     ln=(lyr["ln1_g"], lyr["ln1_b"]))            # fused LN+QKV
        a = attention(qkv.reshape(b, s, 3 * E)).reshape(b * s, E)
        h = linear(a, lyr["wo"], lyr["bo"], residual=x2).reshape(b, s, E)
        # --- MLP block, fully fused (LN -> fc1 -> GELU -> fc2 -> +residual) --
        x2 = h.reshape(b * s, E)
        h = mlp_block(x2, lyr["ln2_g"], lyr["ln2_b"],
                      lyr["w1"], lyr["b1"], lyr["w2"], lyr["b2"]
                      ).reshape(b, s, E)

    # final LayerNorm is per-token, so applying it only to the CLS token is
    # equivalent to torchvision's LN-then-slice; head output padded to 128
    # lanes for unmasked stores and sliced to 18 classes here.
    cls_tok = h[:, 0]                                            # (B, E)
    logits = linear(cls_tok, params["head_w"], params["head_b"],
                    ln=(params["lnf_g"], params["lnf_b"]))       # (B, 128)
    return logits[:, :N_CLASSES]                                 # (B, 18)


# ------------------------------ parameters ----------------------------------
def init_params(key):
    # TODO(synk): loading the pretrained torchvision ViT_B_16 weights has no
    # in-script equivalent; synthetic deterministic init is used instead.
    def nrm(k, shape, std=0.02):
        return std * jax.random.normal(k, shape, dtype=jnp.float32)

    keys = jax.random.split(key, 4 + LAYERS)
    head_w = jnp.zeros((E, HEAD_PAD), jnp.float32)
    head_w = head_w.at[:, :N_CLASSES].set(nrm(keys[3], (E, N_CLASSES)))
    params = {
        "conv_w": nrm(keys[0], (C_IN * PATCH * PATCH, E)).astype(jnp.bfloat16),
        "conv_b": jnp.zeros((E,), jnp.float32),
        "cls":    nrm(keys[1], (1, 1, E)),
        "pos":    nrm(keys[2], (1, SEQ, E)),
        "lnf_g":  jnp.ones((E,), jnp.float32),
        "lnf_b":  jnp.zeros((E,), jnp.float32),
        "head_w": head_w.astype(jnp.bfloat16),
        "head_b": jnp.zeros((HEAD_PAD,), jnp.float32),
        "layers": [],
    }
    for i in range(LAYERS):
        lk = jax.random.split(keys[4 + i], 4)
        params["layers"].append({
            "ln1_g": jnp.ones((E,), jnp.float32),
            "ln1_b": jnp.zeros((E,), jnp.float32),
            "wqkv": nrm(lk[0], (E, 3 * E)).astype(jnp.bfloat16),
            "bqkv": jnp.zeros((3 * E,), jnp.float32),
            "wo": nrm(lk[1], (E, E)).astype(jnp.bfloat16),
            "bo": jnp.zeros((E,), jnp.float32),
            "ln2_g": jnp.ones((E,), jnp.float32),
            "ln2_b": jnp.zeros((E,), jnp.float32),
            "w1": nrm(lk[2], (E, MLP)).astype(jnp.bfloat16),
            "b1": jnp.zeros((MLP,), jnp.float32),
            "w2": nrm(lk[3], (MLP, E)).astype(jnp.bfloat16),
            "b2": jnp.zeros((E,), jnp.float32),
        })
    return params


if __name__ == "__main__":
    key = jax.random.PRNGKey(0)
    pkey, xkey = jax.random.split(key)
    params = init_params(pkey)
    x = jax.random.normal(xkey, (2, C_IN, IMG, IMG), dtype=jnp.float32)

    logits = jax.jit(vit_forward)(params, x)
    logits = jax.block_until_ready(logits)
    assert logits.shape == (2, N_CLASSES)
    assert bool(jnp.all(jnp.isfinite(logits)))
    print("KERNEL_OK")
</pallas_src>

<mosaic_0001>
module attributes {stable_mosaic.version = 11 : i64} {
  func.func @_linear_kernel(%arg0: i32, %arg1: memref<8x768xf32, #tpu.memory_space<vmem>>, %arg2: memref<768x128xbf16, #tpu.memory_space<vmem>>, %arg3: memref<1x128xf32, #tpu.memory_space<vmem>>, %arg4: memref<8x128xf32, #tpu.memory_space<vmem>>) attributes {dimension_semantics = [#tpu.dimension_semantics<parallel>], iteration_bounds = array<i64: 1>, scalar_prefetch = 0 : i64, scratch_operands = 0 : i64, tpu.core_type = #tpu.core_type<tc>, window_params = [{transform_indices = @transform_0, window_bounds = array<i64: 8, 768>}, {pipeline_mode = #tpu.pipeline_mode<synchronous>, transform_indices = @transform_1, window_bounds = array<i64: 768, 128>}, {pipeline_mode = #tpu.pipeline_mode<synchronous>, transform_indices = @transform_2, window_bounds = array<i64: 1, 128>}, {transform_indices = @transform_3, window_bounds = array<i64: 8, 128>}]} {
    %c0 = arith.constant 0 : index
    %c0_0 = arith.constant 0 : index
    %0 = vector.load %arg1[%c0, %c0_0] : memref<8x768xf32, #tpu.memory_space<vmem>>, vector<8x768xf32>
    %1 = arith.truncf %0 : vector<8x768xf32> to vector<8x768xbf16>
    %c0_1 = arith.constant 0 : index
    %c0_2 = arith.constant 0 : index
    %2 = vector.load %arg2[%c0_1, %c0_2] : memref<768x128xbf16, #tpu.memory_space<vmem>>, vector<768x128xbf16>
    %cst = arith.constant dense<0.000000e+00> : vector<8x128xf32>
    %3 = tpu.matmul %1, %2, %cst {dimension_numbers = #tpu.dot_dimension_numbers<[1], [0], [0], [1], [0, 0, 1, 1], [], []>} : vector<8x768xbf16>, vector<768x128xbf16>, vector<8x128xf32> -> vector<8x128xf32>
    %c0_3 = arith.constant 0 : index
    %c0_4 = arith.constant 0 : index
    %4 = vector.load %arg3[%c0_3, %c0_4] : memref<1x128xf32, #tpu.memory_space<vmem>>, vector<1x128xf32>
    %5 = vector.broadcast %4 : vector<1x128xf32> to vector<8x128xf32>
    %6 = arith.addf %3, %5 : vector<8x128xf32>
    %c0_5 = arith.constant 0 : index
    %c0_6 = arith.constant 0 : index
    %7 = vector.load %arg4[%c0_5, %c0_6] : memref<8x128xf32, #tpu.memory_space<vmem>>, vector<8x128xf32>
    tpu.vector_store %arg4[%c0_5, %c0_6], %6 {strides = array<i32>} : memref<8x128xf32, #tpu.memory_space<vmem>>, vector<8x128xf32>,
    return
  }
  func.func @transform_0(%arg0: i32) -> (i32, i32) {
    %c0_i32 = arith.constant 0 : i32
    %c0_i32_0 = arith.constant 0 : i32
    return %arg0, %c0_i32 : i32, i32
  }
  func.func @transform_1(%arg0: i32) -> (i32, i32) {
    %c0_i32 = arith.constant 0 : i32
    %c0_i32_0 = arith.constant 0 : i32
    %c0_i32_1 = arith.constant 0 : i32
    return %c0_i32, %c0_i32_0 : i32, i32
  }
  func.func @transform_2(%arg0: i32) -> (i32, i32) {
    %c0_i32 = arith.constant 0 : i32
    %c0_i32_0 = arith.constant 0 : i32
    %c0_i32_1 = arith.constant 0 : i32
    return %c0_i32, %c0_i32_0 : i32, i32
  }
  func.func @transform_3(%arg0: i32) -> (i32, i32) {
    %c0_i32 = arith.constant 0 : i32
    %c0_i32_0 = arith.constant 0 : i32
    return %arg0, %c0_i32 : i32, i32
  }
}

module attributes {stable_mosaic.version = 11 : i64} {
  func.func @_ln_linear_kernel(%arg0: i32, %arg1: memref<10x128xf32, #tpu.memory_space<vmem>>, %arg2: memref<1x128xf32, #tpu.memory_space<vmem>>, %arg3: memref<1x128xf32, #tpu.memory_space<vmem>>, %arg4: memref<128x384xbf16, #tpu.memory_space<vmem>>, %arg5: memref<1x384xf32, #tpu.memory_space<vmem>>, %arg6: memref<10x384xf32, #tpu.memory_space<vmem>>) attributes {dimension_semantics = [#tpu.dimension_semantics<parallel>], iteration_bounds = array<i64: 1>, scalar_prefetch = 0 : i64, scratch_operands = 0 : i64, tpu.core_type = #tpu.core_type<tc>, window_params = [{transform_indices = @transform_0, window_bounds = array<i64: 10, 128>}, {pipeline_mode = #tpu.pipeline_mode<synchronous>, transform_indices = @transform_1, window_bounds = array<i64: 1, 128>}, {pipeline_mode = #tpu.pipeline_mode<synchronous>, transform_indices = @transform_2, window_bounds = array<i64: 1, 128>}, {pipeline_mode = #tpu.pipeline_mode<synchronous>, transform_indices = @transform_3, window_bounds = array<i64: 128, 384>}, {pipeline_mode = #tpu.pipeline_mode<synchronous>, transform_indices = @transform_4, window_bounds = array<i64: 1, 384>}, {transform_indices = @transform_5, window_bounds = array<i64: 10, 384>}]} {
    %c0 = arith.constant 0 : index
    %c0_0 = arith.constant 0 : index
    %0 = vector.load %arg1[%c0, %c0_0] : memref<10x128xf32, #tpu.memory_space<vmem>>, vector<10x128xf32>
    %c0_1 = arith.constant 0 : index
    %c0_2 = arith.constant 0 : index
    %1 = vector.load %arg2[%c0_1, %c0_2] : memref<1x128xf32, #tpu.memory_space<vmem>>, vector<1x128xf32>
    %c0_3 = arith.constant 0 : index
    %c0_4 = arith.constant 0 : index
    %2 = vector.load %arg3[%c0_3, %c0_4] : memref<1x128xf32, #tpu.memory_space<vmem>>, vector<1x128xf32>
    %cst = arith.constant dense<0.000000e+00> : vector<10xf32>
    %3 = vector.multi_reduction <add>, %0, %cst [1] : vector<10x128xf32> to vector<10xf32>
    %4 = vector.shape_cast %3 : vector<10xf32> to vector<10x1xf32>
    %cst_5 = arith.constant 1.280000e+02 : f32
    %5 = vector.broadcast %cst_5 : f32 to vector<10x1xf32>
    %6 = arith.divf %4, %5 : vector<10x1xf32>
    %7 = vector.broadcast %6 : vector<10x1xf32> to vector<10x128xf32>
    %8 = arith.subf %0, %7 : vector<10x128xf32>
    %9 = arith.mulf %8, %8 : vector<10x128xf32>
    %cst_6 = arith.constant dense<0.000000e+00> : vector<10xf32>
    %10 = vector.multi_reduction <add>, %9, %cst_6 [1] : vector<10x128xf32> to vector<10xf32>
    %11 = vector.shape_cast %10 : vector<10xf32> to vector<10x1xf32>
    %cst_7 = arith.constant 1.280000e+02 : f32
    %12 = vector.broadcast %cst_7 : f32 to vector<10x1xf32>
    %13 = arith.divf %11, %12 : vector<10x1xf32>
    %14 = vector.broadcast %6 : vector<10x1xf32> to vector<10x128xf32>
    %15 = arith.subf %0, %14 : vector<10x128xf32>
    %cst_8 = arith.constant 9.99999997E-7 : f32
    %16 = vector.broadcast %cst_8 : f32 to vector<10x1xf32>
    %17 = arith.addf %13, %16 : vector<10x1xf32>
    %18 = math.rsqrt %17 : vector<10x1xf32>
    %19 = vector.broadcast %18 : vector<10x1xf32> to vector<10x128xf32>
    %20 = arith.mulf %15, %19 : vector<10x128xf32>
    %21 = vector.broadcast %1 : vector<1x128xf32> to vector<10x128xf32>
    %22 = arith.mulf %20, %21 : vector<10x128xf32>
    %23 = vector.broadcast %2 : vector<1x128xf32> to vector<10x128xf32>
    %24 = arith.addf %22, %23 : vector<10x128xf32>
    %25 = arith.truncf %24 : vector<10x128xf32> to vector<10x128xbf16>
    %c0_9 = arith.constant 0 : index
    %c0_10 = arith.constant 0 : index
    %26 = vector.load %arg4[%c0_9, %c0_10] : memref<128x384xbf16, #tpu.memory_space<vmem>>, vector<128x384xbf16>
    %cst_11 = arith.constant dense<0.000000e+00> : vector<10x384xf32>
    %27 = tpu.matmul %25, %26, %cst_11 {dimension_numbers = #tpu.dot_dimension_numbers<[1], [0], [0], [1], [0, 0, 1, 1], [], []>} : vector<10x128xbf16>, vector<128x384xbf16>, vector<10x384xf32> -> vector<10x384xf32>
    %c0_12 = arith.constant 0 : index
    %c0_13 = arith.constant 0 : index
    %28 = vector.load %arg5[%c0_12, %c0_13] : memref<1x384xf32, #tpu.memory_space<vmem>>, vector<1x384xf32>
    %29 = vector.broadcast %28 : vector<1x384xf32> to vector<10x384xf32>
    %30 = arith.addf %27, %29 : vector<10x384xf32>
    %c0_14 = arith.constant 0 : index
    %c0_15 = arith.constant 0 : index
    %31 = vector.load %arg6[%c0_14, %c0_15] : memref<10x384xf32, #tpu.memory_space<vmem>>, vector<10x384xf32>
    tpu.vector_store %arg6[%c0_14, %c0_15], %30 {strides = array<i32>} : memref<10x384xf32, #tpu.memory_space<vmem>>, vector<10x384xf32>,
    return
  }
  func.func @transform_0(%arg0: i32) -> (i32, i32) {
    %c0_i32 = arith.constant 0 : i32
    %c0_i32_0 = arith.constant 0 : i32
    return %arg0, %c0_i32 : i32, i32
  }
  func.func @transform_1(%arg0: i32) -> (i32, i32) {
    %c0_i32 = arith.constant 0 : i32
    %c0_i32_0 = arith.constant 0 : i32
    %c0_i32_1 = arith.constant 0 : i32
    return %c0_i32, %c0_i32_0 : i32, i32
  }
  func.func @transform_2(%arg0: i32) -> (i32, i32) {
    %c0_i32 = arith.constant 0 : i32
    %c0_i32_0 = arith.constant 0 : i32
    %c0_i32_1 = arith.constant 0 : i32
    return %c0_i32, %c0_i32_0 : i32, i32
  }
  func.func @transform_3(%arg0: i32) -> (i32, i32) {
    %c0_i32 = arith.constant 0 : i32
    %c0_i32_0 = arith.constant 0 : i32
    %c0_i32_1 = arith.constant 0 : i32
    return %c0_i32, %c0_i32_0 : i32, i32
  }
  func.func @transform_4(%arg0: i32) -> (i32, i32) {
    %c0_i32 = arith.constant 0 : i32
    %c0_i32_0 = arith.constant 0 : i32
    %c0_i32_1 = arith.constant 0 : i32
    return %c0_i32, %c0_i32_0 : i32, i32
  }
  func.func @transform_5(%arg0: i32) -> (i32, i32) {
    %c0_i32 = arith.constant 0 : i32
    %c0_i32_0 = arith.constant 0 : i32
    return %arg0, %c0_i32 : i32, i32
  }
}

module attributes {stable_mosaic.version = 11 : i64} {
  func.func @_attn_kernel(%arg0: i32, %arg1: memref<1x5x384xf32, #tpu.memory_space<vmem>>, %arg2: memref<1x5x128xf32, #tpu.memory_space<vmem>>) attributes {dimension_semantics = [#tpu.dimension_semantics<parallel>], iteration_bounds = array<i64: 2>, scalar_prefetch = 0 : i64, scratch_operands = 0 : i64, tpu.core_type = #tpu.core_type<tc>, window_params = [{transform_indices = @transform_0, window_bounds = array<i64: 1, 5, 384>}, {transform_indices = @transform_1, window_bounds = array<i64: 1, 5, 128>}]} {
    %c0 = arith.constant 0 : index
    %c0_0 = arith.constant 0 : index
    %c0_1 = arith.constant 0 : index
    %0 = vector.load %arg1[%c0, %c0_0, %c0_1] : memref<1x5x384xf32, #tpu.memory_space<vmem>>, vector<1x5x384xf32>
    %1 = vector.shape_cast %0 : vector<1x5x384xf32> to vector<5x384xf32>
    %2 = vector.extract_strided_slice %1 {offsets = [0, 0], sizes = [5, 32], strides = [1, 1]} : vector<5x384xf32> to vector<5x32xf32>
    %3 = arith.truncf %2 : vector<5x32xf32> to vector<5x32xbf16>
    %4 = vector.extract_strided_slice %1 {offsets = [0, 128], sizes = [5, 32], strides = [1, 1]} : vector<5x384xf32> to vector<5x32xf32>
    %5 = arith.truncf %4 : vector<5x32xf32> to vector<5x32xbf16>
    %6 = vector.extract_strided_slice %1 {offsets = [0, 256], sizes = [5, 32], strides = [1, 1]} : vector<5x384xf32> to vector<5x32xf32>
    %7 = arith.truncf %6 : vector<5x32xf32> to vector<5x32xbf16>
    %cst = arith.constant dense<0.000000e+00> : vector<5x5xf32>
    %8 = tpu.matmul %3, %5, %cst {dimension_numbers = #tpu.dot_dimension_numbers<[1], [1], [0], [0], [0, 0, 1, 0], [], []>} : vector<5x32xbf16>, vector<5x32xbf16>, vector<5x5xf32> -> vector<5x5xf32>
    %cst_2 = arith.constant 0.176776692 : f32
    %9 = vector.broadcast %cst_2 : f32 to vector<5x5xf32>
    %10 = arith.mulf %8, %9 : vector<5x5xf32>
    %cst_3 = arith.constant dense<0xFF800000> : vector<5xf32>
    %11 = vector.multi_reduction <maximumf>, %10, %cst_3 [1] : vector<5x5xf32> to vector<5xf32>
    %12 = vector.shape_cast %11 : vector<5xf32> to vector<5x1xf32>
    %13 = vector.broadcast %12 : vector<5x1xf32> to vector<5x5xf32>
    %14 = arith.subf %10, %13 : vector<5x5xf32>
    %15 = math.exp %14 : vector<5x5xf32>
    %cst_4 = arith.constant dense<0.000000e+00> : vector<5xf32>
    %16 = vector.multi_reduction <add>, %15, %cst_4 [1] : vector<5x5xf32> to vector<5xf32>
    %17 = vector.shape_cast %16 : vector<5xf32> to vector<5x1xf32>
    %18 = tpu.reciprocal %17 {approx = true} : vector<5x1xf32> -> vector<5x1xf32>
    %19 = arith.truncf %15 : vector<5x5xf32> to vector<5x5xbf16>
    %cst_5 = arith.constant dense<0.000000e+00> : vector<5x32xf32>
    %20 = tpu.matmul %19, %7, %cst_5 {dimension_numbers = #tpu.dot_dimension_numbers<[1], [0], [0], [1], [0, 0, 1, 1], [], []>} : vector<5x5xbf16>, vector<5x32xbf16>, vector<5x32xf32> -> vector<5x32xf32>
    %21 = vector.broadcast %18 : vector<5x1xf32> to vector<5x32xf32>
    %22 = arith.mulf %20, %21 : vector<5x32xf32>
    %23 = vector.extract_strided_slice %1 {offsets = [0, 32], sizes = [5, 32], strides = [1, 1]} : vector<5x384xf32> to vector<5x32xf32>
    %24 = arith.truncf %23 : vector<5x32xf32> to vector<5x32xbf16>
    %25 = vector.extract_strided_slice %1 {offsets = [0, 160], sizes = [5, 32], strides = [1, 1]} : vector<5x384xf32> to vector<5x32xf32>
    %26 = arith.truncf %25 : vector<5x32xf32> to vector<5x32xbf16>
    %27 = vector.extract_strided_slice %1 {offsets = [0, 288], sizes = [5, 32], strides = [1, 1]} : vector<5x384xf32> to vector<5x32xf32>
    %28 = arith.truncf %27 : vector<5x32xf32> to vector<5x32xbf16>
    %cst_6 = arith.constant dense<0.000000e+00> : vector<5x5xf32>
    %29 = tpu.matmul %24, %26, %cst_6 {dimension_numbers = #tpu.dot_dimension_numbers<[1], [1], [0], [0], [0, 0, 1, 0], [], []>} : vector<5x32xbf16>, vector<5x32xbf16>, vector<5x5xf32> -> vector<5x5xf32>
    %cst_7 = arith.constant 0.176776692 : f32
    %30 = vector.broadcast %cst_7 : f32 to vector<5x5xf32>
    %31 = arith.mulf %29, %30 : vector<5x5xf32>
    %cst_8 = arith.constant dense<0xFF800000> : vector<5xf32>
    %32 = vector.multi_reduction <maximumf>, %31, %cst_8 [1] : vector<5x5xf32> to vector<5xf32>
    %33 = vector.shape_cast %32 : vector<5xf32> to vector<5x1xf32>
    %34 = vector.broadcast %33 : vector<5x1xf32> to vector<5x5xf32>
    %35 = arith.subf %31, %34 : vector<5x5xf32>
    %36 = math.exp %35 : vector<5x5xf32>
    %cst_9 = arith.constant dense<0.000000e+00> : vector<5xf32>
    %37 = vector.multi_reduction <add>, %36, %cst_9 [1] : vector<5x5xf32> to vector<5xf32>
    %38 = vector.shape_cast %37 : vector<5xf32> to vector<5x1xf32>
    %39 = tpu.reciprocal %38 {approx = true} : vector<5x1xf32> -> vector<5x1xf32>
    %40 = arith.truncf %36 : vector<5x5xf32> to vector<5x5xbf16>
    %cst_10 = arith.constant dense<0.000000e+00> : vector<5x32xf32>
    %41 = tpu.matmul %40, %28, %cst_10 {dimension_numbers = #tpu.dot_dimension_numbers<[1], [0], [0], [1], [0, 0, 1, 1], [], []>} : vector<5x5xbf16>, vector<5x32xbf16>, vector<5x32xf32> -> vector<5x32xf32>
    %42 = vector.broadcast %39 : vector<5x1xf32> to vector<5x32xf32>
    %43 = arith.mulf %41, %42 : vector<5x32xf32>
    %44 = vector.extract_strided_slice %1 {offsets = [0, 64], sizes = [5, 32], strides = [1, 1]} : vector<5x384xf32> to vector<5x32xf32>
    %45 = arith.truncf %44 : vector<5x32xf32> to vector<5x32xbf16>
    %46 = vector.extract_strided_slice %1 {offsets = [0, 192], sizes = [5, 32], strides = [1, 1]} : vector<5x384xf32> to vector<5x32xf32>
    %47 = arith.truncf %46 : vector<5x32xf32> to vector<5x32xbf16>
    %48 = vector.extract_strided_slice %1 {offsets = [0, 320], sizes = [5, 32], strides = [1, 1]} : vector<5x384xf32> to vector<5x32xf32>
    %49 = arith.truncf %48 : vector<5x32xf32> to vector<5x32xbf16>
    %cst_11 = arith.constant dense<0.000000e+00> : vector<5x5xf32>
    %50 = tpu.matmul %45, %47, %cst_11 {dimension_numbers = #tpu.dot_dimension_numbers<[1], [1], [0], [0], [0, 0, 1, 0], [], []>} : vector<5x32xbf16>, vector<5x32xbf16>, vector<5x5xf32> -> vector<5x5xf32>
    %cst_12 = arith.constant 0.176776692 : f32
    %51 = vector.broadcast %cst_12 : f32 to vector<5x5xf32>
    %52 = arith.mulf %50, %51 : vector<5x5xf32>
    %cst_13 = arith.constant dense<0xFF800000> : vector<5xf32>
    %53 = vector.multi_reduction <maximumf>, %52, %cst_13 [1] : vector<5x5xf32> to vector<5xf32>
    %54 = vector.shape_cast %53 : vector<5xf32> to vector<5x1xf32>
    %55 = vector.broadcast %54 : vector<5x1xf32> to vector<5x5xf32>
    %56 = arith.subf %52, %55 : vector<5x5xf32>
    %57 = math.exp %56 : vector<5x5xf32>
    %cst_14 = arith.constant dense<0.000000e+00> : vector<5xf32>
    %58 = vector.multi_reduction <add>, %57, %cst_14 [1] : vector<5x5xf32> to vector<5xf32>
    %59 = vector.shape_cast %58 : vector<5xf32> to vector<5x1xf32>
    %60 = tpu.reciprocal %59 {approx = true} : vector<5x1xf32> -> vector<5x1xf32>
    %61 = arith.truncf %57 : vector<5x5xf32> to vector<5x5xbf16>
    %cst_15 = arith.constant dense<0.000000e+00> : vector<5x32xf32>
    %62 = tpu.matmul %61, %49, %cst_15 {dimension_numbers = #tpu.dot_dimension_numbers<[1], [0], [0], [1], [0, 0, 1, 1], [], []>} : vector<5x5xbf16>, vector<5x32xbf16>, vector<5x32xf32> -> vector<5x32xf32>
    %63 = vector.broadcast %60 : vector<5x1xf32> to vector<5x32xf32>
    %64 = arith.mulf %62, %63 : vector<5x32xf32>
    %65 = vector.extract_strided_slice %1 {offsets = [0, 96], sizes = [5, 32], strides = [1, 1]} : vector<5x384xf32> to vector<5x32xf32>
    %66 = arith.truncf %65 : vector<5x32xf32> to vector<5x32xbf16>
    %67 = vector.extract_strided_slice %1 {offsets = [0, 224], sizes = [5, 32], strides = [1, 1]} : vector<5x384xf32> to vector<5x32xf32>
    %68 = arith.truncf %67 : vector<5x32xf32> to vector<5x32xbf16>
    %69 = vector.extract_strided_slice %1 {offsets = [0, 352], sizes = [5, 32], strides = [1, 1]} : vector<5x384xf32> to vector<5x32xf32>
    %70 = arith.truncf %69 : vector<5x32xf32> to vector<5x32xbf16>
    %cst_16 = arith.constant dense<0.000000e+00> : vector<5x5xf32>
    %71 = tpu.matmul %66, %68, %cst_16 {dimension_numbers = #tpu.dot_dimension_numbers<[1], [1], [0], [0], [0, 0, 1, 0], [], []>} : vector<5x32xbf16>, vector<5x32xbf16>, vector<5x5xf32> -> vector<5x5xf32>
    %cst_17 = arith.constant 0.176776692 : f32
    %72 = vector.broadcast %cst_17 : f32 to vector<5x5xf32>
    %73 = arith.mulf %71, %72 : vector<5x5xf32>
    %cst_18 = arith.constant dense<0xFF800000> : vector<5xf32>
    %74 = vector.multi_reduction <maximumf>, %73, %cst_18 [1] : vector<5x5xf32> to vector<5xf32>
    %75 = vector.shape_cast %74 : vector<5xf32> to vector<5x1xf32>
    %76 = vector.broadcast %75 : vector<5x1xf32> to vector<5x5xf32>
    %77 = arith.subf %73, %76 : vector<5x5xf32>
    %78 = math.exp %77 : vector<5x5xf32>
    %cst_19 = arith.constant dense<0.000000e+00> : vector<5xf32>
    %79 = vector.multi_reduction <add>, %78, %cst_19 [1] : vector<5x5xf32> to vector<5xf32>
    %80 = vector.shape_cast %79 : vector<5xf32> to vector<5x1xf32>
    %81 = tpu.reciprocal %80 {approx = true} : vector<5x1xf32> -> vector<5x1xf32>
    %82 = arith.truncf %78 : vector<5x5xf32> to vector<5x5xbf16>
    %cst_20 = arith.constant dense<0.000000e+00> : vector<5x32xf32>
    %83 = tpu.matmul %82, %70, %cst_20 {dimension_numbers = #tpu.dot_dimension_numbers<[1], [0], [0], [1], [0, 0, 1, 1], [], []>} : vector<5x5xbf16>, vector<5x32xbf16>, vector<5x32xf32> -> vector<5x32xf32>
    %84 = vector.broadcast %81 : vector<5x1xf32> to vector<5x32xf32>
    %85 = arith.mulf %83, %84 : vector<5x32xf32>
    %86 = tpu.concatenate %22, %43, %64, %85 in 1 : vector<5x32xf32>, vector<5x32xf32>, vector<5x32xf32>, vector<5x32xf32> -> vector<5x128xf32>
    %c0_21 = arith.constant 0 : index
    %c0_22 = arith.constant 0 : index
    %c0_23 = arith.constant 0 : index
    %87 = vector.load %arg2[%c0_21, %c0_22, %c0_23] : memref<1x5x128xf32, #tpu.memory_space<vmem>>, vector<1x5x128xf32>
    %88 = vector.shape_cast %87 : vector<1x5x128xf32> to vector<5x128xf32>
    %89 = vector.shape_cast %86 : vector<5x128xf32> to vector<1x5x128xf32>
    tpu.vector_store %arg2[%c0_21, %c0_22, %c0_23], %89 {strides = array<i32>} : memref<1x5x128xf32, #tpu.memory_space<vmem>>, vector<1x5x128xf32>,
    return
  }
  func.func @transform_0(%arg0: i32) -> (i32, i32, i32) {
    %c0_i32 = arith.constant 0 : i32
    %c0_i32_0 = arith.constant 0 : i32
    %c0_i32_1 = arith.constant 0 : i32
    return %arg0, %c0_i32, %c0_i32_0 : i32, i32, i32
  }
  func.func @transform_1(%arg0: i32) -> (i32, i32, i32) {
    %c0_i32 = arith.constant 0 : i32
    %c0_i32_0 = arith.constant 0 : i32
    %c0_i32_1 = arith.constant 0 : i32
    return %arg0, %c0_i32, %c0_i32_0 : i32, i32, i32
  }
}

module attributes {stable_mosaic.version = 11 : i64} {
  func.func @_linear_res_kernel(%arg0: i32, %arg1: memref<10x128xf32, #tpu.memory_space<vmem>>, %arg2: memref<128x128xbf16, #tpu.memory_space<vmem>>, %arg3: memref<1x128xf32, #tpu.memory_space<vmem>>, %arg4: memref<10x128xf32, #tpu.memory_space<vmem>>, %arg5: memref<10x128xf32, #tpu.memory_space<vmem>>) attributes {dimension_semantics = [#tpu.dimension_semantics<parallel>], iteration_bounds = array<i64: 1>, scalar_prefetch = 0 : i64, scratch_operands = 0 : i64, tpu.core_type = #tpu.core_type<tc>, window_params = [{transform_indices = @transform_0, window_bounds = array<i64: 10, 128>}, {pipeline_mode = #tpu.pipeline_mode<synchronous>, transform_indices = @transform_1, window_bounds = array<i64: 128, 128>}, {pipeline_mode = #tpu.pipeline_mode<synchronous>, transform_indices = @transform_2, window_bounds = array<i64: 1, 128>}, {transform_indices = @transform_3, window_bounds = array<i64: 10, 128>}, {transform_indices = @transform_4, window_bounds = array<i64: 10, 128>}]} {
    %c0 = arith.constant 0 : index
    %c0_0 = arith.constant 0 : index
    %0 = vector.load %arg1[%c0, %c0_0] : memref<10x128xf32, #tpu.memory_space<vmem>>, vector<10x128xf32>
    %1 = arith.truncf %0 : vector<10x128xf32> to vector<10x128xbf16>
    %c0_1 = arith.constant 0 : index
    %c0_2 = arith.constant 0 : index
    %2 = vector.load %arg2[%c0_1, %c0_2] : memref<128x128xbf16, #tpu.memory_space<vmem>>, vector<128x128xbf16>
    %cst = arith.constant dense<0.000000e+00> : vector<10x128xf32>
    %3 = tpu.matmul %1, %2, %cst {dimension_numbers = #tpu.dot_dimension_numbers<[1], [0], [0], [1], [0, 0, 1, 1], [], []>} : vector<10x128xbf16>, vector<128x128xbf16>, vector<10x128xf32> -> vector<10x128xf32>
    %c0_3 = arith.constant 0 : index
    %c0_4 = arith.constant 0 : index
    %4 = vector.load %arg3[%c0_3, %c0_4] : memref<1x128xf32, #tpu.memory_space<vmem>>, vector<1x128xf32>
    %5 = vector.broadcast %4 : vector<1x128xf32> to vector<10x128xf32>
    %6 = arith.addf %3, %5 : vector<10x128xf32>
    %c0_5 = arith.constant 0 : index
    %c0_6 = arith.constant 0 : index
    %7 = vector.load %arg4[%c0_5, %c0_6] : memref<10x128xf32, #tpu.memory_space<vmem>>, vector<10x128xf32>
    %8 = arith.addf %6, %7 : vector<10x128xf32>
    %c0_7 = arith.constant 0 : index
    %c0_8 = arith.constant 0 : index
    %9 = vector.load %arg5[%c0_7, %c0_8] : memref<10x128xf32, #tpu.memory_space<vmem>>, vector<10x128xf32>
    tpu.vector_store %arg5[%c0_7, %c0_8], %8 {strides = array<i32>} : memref<10x128xf32, #tpu.memory_space<vmem>>, vector<10x128xf32>,
    return
  }
  func.func @transform_0(%arg0: i32) -> (i32, i32) {
    %c0_i32 = arith.constant 0 : i32
    %c0_i32_0 = arith.constant 0 : i32
    return %arg0, %c0_i32 : i32, i32
  }
  func.func @transform_1(%arg0: i32) -> (i32, i32) {
    %c0_i32 = arith.constant 0 : i32
    %c0_i32_0 = arith.constant 0 : i32
    %c0_i32_1 = arith.constant 0 : i32
    return %c0_i32, %c0_i32_0 : i32, i32
  }
  func.func @transform_2(%arg0: i32) -> (i32, i32) {
    %c0_i32 = arith.constant 0 : i32
    %c0_i32_0 = arith.constant 0 : i32
    %c0_i32_1 = arith.constant 0 : i32
    return %c0_i32, %c0_i32_0 : i32, i32
  }
  func.func @transform_3(%arg0: i32) -> (i32, i32) {
    %c0_i32 = arith.constant 0 : i32
    %c0_i32_0 = arith.constant 0 : i32
    return %arg0, %c0_i32 : i32, i32
  }
  func.func @transform_4(%arg0: i32) -> (i32, i32) {
    %c0_i32 = arith.constant 0 : i32
    %c0_i32_0 = arith.constant 0 : i32
    return %arg0, %c0_i32 : i32, i32
  }
}

module attributes {stable_mosaic.version = 11 : i64} {
  func.func @_ln_mlp_kernel(%arg0: i32, %arg1: memref<10x128xf32, #tpu.memory_space<vmem>>, %arg2: memref<1x128xf32, #tpu.memory_space<vmem>>, %arg3: memref<1x128xf32, #tpu.memory_space<vmem>>, %arg4: memref<128x256xbf16, #tpu.memory_space<vmem>>, %arg5: memref<1x256xf32, #tpu.memory_space<vmem>>, %arg6: memref<256x128xbf16, #tpu.memory_space<vmem>>, %arg7: memref<1x128xf32, #tpu.memory_space<vmem>>, %arg8: memref<10x128xf32, #tpu.memory_space<vmem>>) attributes {dimension_semantics = [#tpu.dimension_semantics<parallel>], iteration_bounds = array<i64: 1>, scalar_prefetch = 0 : i64, scratch_operands = 0 : i64, tpu.core_type = #tpu.core_type<tc>, window_params = [{transform_indices = @transform_0, window_bounds = array<i64: 10, 128>}, {pipeline_mode = #tpu.pipeline_mode<synchronous>, transform_indices = @transform_1, window_bounds = array<i64: 1, 128>}, {pipeline_mode = #tpu.pipeline_mode<synchronous>, transform_indices = @transform_2, window_bounds = array<i64: 1, 128>}, {pipeline_mode = #tpu.pipeline_mode<synchronous>, transform_indices = @transform_3, window_bounds = array<i64: 128, 256>}, {pipeline_mode = #tpu.pipeline_mode<synchronous>, transform_indices = @transform_4, window_bounds = array<i64: 1, 256>}, {pipeline_mode = #tpu.pipeline_mode<synchronous>, transform_indices = @transform_5, window_bounds = array<i64: 256, 128>}, {pipeline_mode = #tpu.pipeline_mode<synchronous>, transform_indices = @transform_6, window_bounds = array<i64: 1, 128>}, {transform_indices = @transform_7, window_bounds = array<i64: 10, 128>}]} {
    %c0 = arith.constant 0 : index
    %c0_0 = arith.constant 0 : index
    %0 = vector.load %arg1[%c0, %c0_0] : memref<10x128xf32, #tpu.memory_space<vmem>>, vector<10x128xf32>
    %c0_1 = arith.constant 0 : index
    %c0_2 = arith.constant 0 : index
    %1 = vector.load %arg2[%c0_1, %c0_2] : memref<1x128xf32, #tpu.memory_space<vmem>>, vector<1x128xf32>
    %c0_3 = arith.constant 0 : index
    %c0_4 = arith.constant 0 : index
    %2 = vector.load %arg3[%c0_3, %c0_4] : memref<1x128xf32, #tpu.memory_space<vmem>>, vector<1x128xf32>
    %cst = arith.constant dense<0.000000e+00> : vector<10xf32>
    %3 = vector.multi_reduction <add>, %0, %cst [1] : vector<10x128xf32> to vector<10xf32>
    %4 = vector.shape_cast %3 : vector<10xf32> to vector<10x1xf32>
    %cst_5 = arith.constant 1.280000e+02 : f32
    %5 = vector.broadcast %cst_5 : f32 to vector<10x1xf32>
    %6 = arith.divf %4, %5 : vector<10x1xf32>
    %7 = vector.broadcast %6 : vector<10x1xf32> to vector<10x128xf32>
    %8 = arith.subf %0, %7 : vector<10x128xf32>
    %9 = arith.mulf %8, %8 : vector<10x128xf32>
    %cst_6 = arith.constant dense<0.000000e+00> : vector<10xf32>
    %10 = vector.multi_reduction <add>, %9, %cst_6 [1] : vector<10x128xf32> to vector<10xf32>
    %11 = vector.shape_cast %10 : vector<10xf32> to vector<10x1xf32>
    %cst_7 = arith.constant 1.280000e+02 : f32
    %12 = vector.broadcast %cst_7 : f32 to vector<10x1xf32>
    %13 = arith.divf %11, %12 : vector<10x1xf32>
    %14 = vector.broadcast %6 : vector<10x1xf32> to vector<10x128xf32>
    %15 = arith.subf %0, %14 : vector<10x128xf32>
    %cst_8 = arith.constant 9.99999997E-7 : f32
    %16 = vector.broadcast %cst_8 : f32 to vector<10x1xf32>
    %17 = arith.addf %13, %16 : vector<10x1xf32>
    %18 = math.rsqrt %17 : vector<10x1xf32>
    %19 = vector.broadcast %18 : vector<10x1xf32> to vector<10x128xf32>
    %20 = arith.mulf %15, %19 : vector<10x128xf32>
    %21 = vector.broadcast %1 : vector<1x128xf32> to vector<10x128xf32>
    %22 = arith.mulf %20, %21 : vector<10x128xf32>
    %23 = vector.broadcast %2 : vector<1x128xf32> to vector<10x128xf32>
    %24 = arith.addf %22, %23 : vector<10x128xf32>
    %25 = arith.truncf %24 : vector<10x128xf32> to vector<10x128xbf16>
    %c0_9 = arith.constant 0 : index
    %c0_10 = arith.constant 0 : index
    %26 = vector.load %arg4[%c0_9, %c0_10] : memref<128x256xbf16, #tpu.memory_space<vmem>>, vector<128x256xbf16>
    %cst_11 = arith.constant dense<0.000000e+00> : vector<10x256xf32>
    %27 = tpu.matmul %25, %26, %cst_11 {dimension_numbers = #tpu.dot_dimension_numbers<[1], [0], [0], [1], [0, 0, 1, 1], [], []>} : vector<10x128xbf16>, vector<128x256xbf16>, vector<10x256xf32> -> vector<10x256xf32>
    %c0_12 = arith.constant 0 : index
    %c0_13 = arith.constant 0 : index
    %28 = vector.load %arg5[%c0_12, %c0_13] : memref<1x256xf32, #tpu.memory_space<vmem>>, vector<1x256xf32>
    %29 = vector.broadcast %28 : vector<1x256xf32> to vector<10x256xf32>
    %30 = arith.addf %27, %29 : vector<10x256xf32>
    %cst_14 = arith.constant 5.000000e-01 : f32
    %31 = vector.broadcast %cst_14 : f32 to vector<10x256xf32>
    %32 = arith.mulf %31, %30 : vector<10x256xf32>
    %cst_15 = arith.constant 0.707106769 : f32
    %33 = vector.broadcast %cst_15 : f32 to vector<10x256xf32>
    %34 = arith.mulf %30, %33 : vector<10x256xf32>
    %cst_16 = arith.constant 0.000000e+00 : f32
    %35 = vector.broadcast %cst_16 : f32 to vector<10x256xf32>
    %36 = arith.cmpf oge, %34, %35 : vector<10x256xf32>
    %cst_17 = arith.constant 1.000000e+00 : f32
    %cst_18 = arith.constant -1.000000e+00 : f32
    %37 = vector.broadcast %cst_17 : f32 to vector<10x256xf32>
    %38 = vector.broadcast %cst_18 : f32 to vector<10x256xf32>
    %39 = arith.select %36, %37, %38 : vector<10x256xi1>, vector<10x256xf32>
    %40 = math.absf %34 : vector<10x256xf32>
    %cst_19 = arith.constant 0.327591091 : f32
    %41 = vector.broadcast %cst_19 : f32 to vector<10x256xf32>
    %42 = arith.mulf %41, %40 : vector<10x256xf32>
    %cst_20 = arith.constant 1.000000e+00 : f32
    %43 = vector.broadcast %cst_20 : f32 to vector<10x256xf32>
    %44 = arith.addf %43, %42 : vector<10x256xf32>
    %cst_21 = arith.constant 1.000000e+00 : f32
    %45 = vector.broadcast %cst_21 : f32 to vector<10x256xf32>
    %46 = arith.divf %45, %44 : vector<10x256xf32>
    %cst_22 = arith.constant 1.06140542 : f32
    %47 = vector.broadcast %cst_22 : f32 to vector<10x256xf32>
    %48 = arith.mulf %47, %46 : vector<10x256xf32>
    %cst_23 = arith.constant -1.45315206 : f32
    %49 = vector.broadcast %cst_23 : f32 to vector<10x256xf32>
    %50 = arith.addf %48, %49 : vector<10x256xf32>
    %51 = arith.mulf %50, %46 : vector<10x256xf32>
    %cst_24 = arith.constant 1.42141378 : f32
    %52 = vector.broadcast %cst_24 : f32 to vector<10x256xf32>
    %53 = arith.addf %51, %52 : vector<10x256xf32>
    %54 = arith.mulf %53, %46 : vector<10x256xf32>
    %cst_25 = arith.constant -0.284496725 : f32
    %55 = vector.broadcast %cst_25 : f32 to vector<10x256xf32>
    %56 = arith.addf %54, %55 : vector<10x256xf32>
    %57 = arith.mulf %56, %46 : vector<10x256xf32>
    %cst_26 = arith.constant 0.254829586 : f32
    %58 = vector.broadcast %cst_26 : f32 to vector<10x256xf32>
    %59 = arith.addf %57, %58 : vector<10x256xf32>
    %60 = arith.mulf %59, %46 : vector<10x256xf32>
    %cst_27 = arith.constant 0.000000e+00 : f32
    %61 = vector.broadcast %cst_27 : f32 to vector<10x256xf32>
    %62 = arith.subf %61, %40 : vector<10x256xf32>
    %63 = arith.mulf %62, %40 : vector<10x256xf32>
    %64 = math.exp %63 : vector<10x256xf32>
    %65 = arith.mulf %60, %64 : vector<10x256xf32>
    %cst_28 = arith.constant 1.000000e+00 : f32
    %66 = vector.broadcast %cst_28 : f32 to vector<10x256xf32>
    %67 = arith.subf %66, %65 : vector<10x256xf32>
    %68 = arith.mulf %39, %67 : vector<10x256xf32>
    %cst_29 = arith.constant 1.000000e+00 : f32
    %69 = vector.broadcast %cst_29 : f32 to vector<10x256xf32>
    %70 = arith.addf %69, %68 : vector<10x256xf32>
    %71 = arith.mulf %32, %70 : vector<10x256xf32>
    %72 = arith.truncf %71 : vector<10x256xf32> to vector<10x256xbf16>
    %c0_30 = arith.constant 0 : index
    %c0_31 = arith.constant 0 : index
    %73 = vector.load %arg6[%c0_30, %c0_31] : memref<256x128xbf16, #tpu.memory_space<vmem>>, vector<256x128xbf16>
    %cst_32 = arith.constant dense<0.000000e+00> : vector<10x128xf32>
    %74 = tpu.matmul %72, %73, %cst_32 {dimension_numbers = #tpu.dot_dimension_numbers<[1], [0], [0], [1], [0, 0, 1, 1], [], []>} : vector<10x256xbf16>, vector<256x128xbf16>, vector<10x128xf32> -> vector<10x128xf32>
    %c0_33 = arith.constant 0 : index
    %c0_34 = arith.constant 0 : index
    %75 = vector.load %arg7[%c0_33, %c0_34] : memref<1x128xf32, #tpu.memory_space<vmem>>, vector<1x128xf32>
    %76 = vector.broadcast %75 : vector<1x128xf32> to vector<10x128xf32>
    %77 = arith.addf %74, %76 : vector<10x128xf32>
    %78 = arith.addf %77, %0 : vector<10x128xf32>
    %c0_35 = arith.constant 0 : index
    %c0_36 = arith.constant 0 : index
    %79 = vector.load %arg8[%c0_35, %c0_36] : memref<10x128xf32, #tpu.memory_space<vmem>>, vector<10x128xf32>
    tpu.vector_store %arg8[%c0_35, %c0_36], %78 {strides = array<i32>} : memref<10x128xf32, #tpu.memory_space<vmem>>, vector<10x128xf32>,
    return
  }
  func.func @transform_0(%arg0: i32) -> (i32, i32) {
    %c0_i32 = arith.constant 0 : i32
    %c0_i32_0 = arith.constant 0 : i32
    return %arg0, %c0_i32 : i32, i32
  }
  func.func @transform_1(%arg0: i32) -> (i32, i32) {
    %c0_i32 = arith.constant 0 : i32
    %c0_i32_0 = arith.constant 0 : i32
    %c0_i32_1 = arith.constant 0 : i32
    return %c0_i32, %c0_i32_0 : i32, i32
  }
  func.func @transform_2(%arg0: i32) -> (i32, i32) {
    %c0_i32 = arith.constant 0 : i32
    %c0_i32_0 = arith.constant 0 : i32
    %c0_i32_1 = arith.constant 0 : i32
    return %c0_i32, %c0_i32_0 : i32, i32
  }
  func.func @transform_3(%arg0: i32) -> (i32, i32) {
    %c0_i32 = arith.constant 0 : i32
    %c0_i32_0 = arith.constant 0 : i32
    %c0_i32_1 = arith.constant 0 : i32
    return %c0_i32, %c0_i32_0 : i32, i32
  }
  func.func @transform_4(%arg0: i32) -> (i32, i32) {
    %c0_i32 = arith.constant 0 : i32
    %c0_i32_0 = arith.constant 0 : i32
    %c0_i32_1 = arith.constant 0 : i32
    return %c0_i32, %c0_i32_0 : i32, i32
  }
  func.func @transform_5(%arg0: i32) -> (i32, i32) {
    %c0_i32 = arith.constant 0 : i32
    %c0_i32_0 = arith.constant 0 : i32
    %c0_i32_1 = arith.constant 0 : i32
    return %c0_i32, %c0_i32_0 : i32, i32
  }
  func.func @transform_6(%arg0: i32) -> (i32, i32) {
    %c0_i32 = arith.constant 0 : i32
    %c0_i32_0 = arith.constant 0 : i32
    %c0_i32_1 = arith.constant 0 : i32
    return %c0_i32, %c0_i32_0 : i32, i32
  }
  func.func @transform_7(%arg0: i32) -> (i32, i32) {
    %c0_i32 = arith.constant 0 : i32
    %c0_i32_0 = arith.constant 0 : i32
    return %arg0, %c0_i32 : i32, i32
  }
}

module attributes {stable_mosaic.version = 11 : i64} {
  func.func @_ln_linear_kernel(%arg0: i32, %arg1: memref<2x128xf32, #tpu.memory_space<vmem>>, %arg2: memref<1x128xf32, #tpu.memory_space<vmem>>, %arg3: memref<1x128xf32, #tpu.memory_space<vmem>>, %arg4: memref<128x128xbf16, #tpu.memory_space<vmem>>, %arg5: memref<1x128xf32, #tpu.memory_space<vmem>>, %arg6: memref<2x128xf32, #tpu.memory_space<vmem>>) attributes {dimension_semantics = [#tpu.dimension_semantics<parallel>], iteration_bounds = array<i64: 1>, scalar_prefetch = 0 : i64, scratch_operands = 0 : i64, tpu.core_type = #tpu.core_type<tc>, window_params = [{transform_indices = @transform_0, window_bounds = array<i64: 2, 128>}, {pipeline_mode = #tpu.pipeline_mode<synchronous>, transform_indices = @transform_1, window_bounds = array<i64: 1, 128>}, {pipeline_mode = #tpu.pipeline_mode<synchronous>, transform_indices = @transform_2, window_bounds = array<i64: 1, 128>}, {pipeline_mode = #tpu.pipeline_mode<synchronous>, transform_indices = @transform_3, window_bounds = array<i64: 128, 128>}, {pipeline_mode = #tpu.pipeline_mode<synchronous>, transform_indices = @transform_4, window_bounds = array<i64: 1, 128>}, {transform_indices = @transform_5, window_bounds = array<i64: 2, 128>}]} {
    %c0 = arith.constant 0 : index
    %c0_0 = arith.constant 0 : index
    %0 = vector.load %arg1[%c0, %c0_0] : memref<2x128xf32, #tpu.memory_space<vmem>>, vector<2x128xf32>
    %c0_1 = arith.constant 0 : index
    %c0_2 = arith.constant 0 : index
    %1 = vector.load %arg2[%c0_1, %c0_2] : memref<1x128xf32, #tpu.memory_space<vmem>>, vector<1x128xf32>
    %c0_3 = arith.constant 0 : index
    %c0_4 = arith.constant 0 : index
    %2 = vector.load %arg3[%c0_3, %c0_4] : memref<1x128xf32, #tpu.memory_space<vmem>>, vector<1x128xf32>
    %cst = arith.constant dense<0.000000e+00> : vector<2xf32>
    %3 = vector.multi_reduction <add>, %0, %cst [1] : vector<2x128xf32> to vector<2xf32>
    %4 = vector.shape_cast %3 : vector<2xf32> to vector<2x1xf32>
    %cst_5 = arith.constant 1.280000e+02 : f32
    %5 = vector.broadcast %cst_5 : f32 to vector<2x1xf32>
    %6 = arith.divf %4, %5 : vector<2x1xf32>
    %7 = vector.broadcast %6 : vector<2x1xf32> to vector<2x128xf32>
    %8 = arith.subf %0, %7 : vector<2x128xf32>
    %9 = arith.mulf %8, %8 : vector<2x128xf32>
    %cst_6 = arith.constant dense<0.000000e+00> : vector<2xf32>
    %10 = vector.multi_reduction <add>, %9, %cst_6 [1] : vector<2x128xf32> to vector<2xf32>
    %11 = vector.shape_cast %10 : vector<2xf32> to vector<2x1xf32>
    %cst_7 = arith.constant 1.280000e+02 : f32
    %12 = vector.broadcast %cst_7 : f32 to vector<2x1xf32>
    %13 = arith.divf %11, %12 : vector<2x1xf32>
    %14 = vector.broadcast %6 : vector<2x1xf32> to vector<2x128xf32>
    %15 = arith.subf %0, %14 : vector<2x128xf32>
    %cst_8 = arith.constant 9.99999997E-7 : f32
    %16 = vector.broadcast %cst_8 : f32 to vector<2x1xf32>
    %17 = arith.addf %13, %16 : vector<2x1xf32>
    %18 = math.rsqrt %17 : vector<2x1xf32>
    %19 = vector.broadcast %18 : vector<2x1xf32> to vector<2x128xf32>
    %20 = arith.mulf %15, %19 : vector<2x128xf32>
    %21 = vector.broadcast %1 : vector<1x128xf32> to vector<2x128xf32>
    %22 = arith.mulf %20, %21 : vector<2x128xf32>
    %23 = vector.broadcast %2 : vector<1x128xf32> to vector<2x128xf32>
    %24 = arith.addf %22, %23 : vector<2x128xf32>
    %25 = arith.truncf %24 : vector<2x128xf32> to vector<2x128xbf16>
    %c0_9 = arith.constant 0 : index
    %c0_10 = arith.constant 0 : index
    %26 = vector.load %arg4[%c0_9, %c0_10] : memref<128x128xbf16, #tpu.memory_space<vmem>>, vector<128x128xbf16>
    %cst_11 = arith.constant dense<0.000000e+00> : vector<2x128xf32>
    %27 = tpu.matmul %25, %26, %cst_11 {dimension_numbers = #tpu.dot_dimension_numbers<[1], [0], [0], [1], [0, 0, 1, 1], [], []>} : vector<2x128xbf16>, vector<128x128xbf16>, vector<2x128xf32> -> vector<2x128xf32>
    %c0_12 = arith.constant 0 : index
    %c0_13 = arith.constant 0 : index
    %28 = vector.load %arg5[%c0_12, %c0_13] : memref<1x128xf32, #tpu.memory_space<vmem>>, vector<1x128xf32>
    %29 = vector.broadcast %28 : vector<1x128xf32> to vector<2x128xf32>
    %30 = arith.addf %27, %29 : vector<2x128xf32>
    %c0_14 = arith.constant 0 : index
    %c0_15 = arith.constant 0 : index
    %31 = vector.load %arg6[%c0_14, %c0_15] : memref<2x128xf32, #tpu.memory_space<vmem>>, vector<2x128xf32>
    tpu.vector_store %arg6[%c0_14, %c0_15], %30 {strides = array<i32>} : memref<2x128xf32, #tpu.memory_space<vmem>>, vector<2x128xf32>,
    return
  }
  func.func @transform_0(%arg0: i32) -> (i32, i32) {
    %c0_i32 = arith.constant 0 : i32
    %c0_i32_0 = arith.constant 0 : i32
    return %arg0, %c0_i32 : i32, i32
  }
  func.func @transform_1(%arg0: i32) -> (i32, i32) {
    %c0_i32 = arith.constant 0 : i32
    %c0_i32_0 = arith.constant 0 : i32
    %c0_i32_1 = arith.constant 0 : i32
    return %c0_i32, %c0_i32_0 : i32, i32
  }
  func.func @transform_2(%arg0: i32) -> (i32, i32) {
    %c0_i32 = arith.constant 0 : i32
    %c0_i32_0 = arith.constant 0 : i32
    %c0_i32_1 = arith.constant 0 : i32
    return %c0_i32, %c0_i32_0 : i32, i32
  }
  func.func @transform_3(%arg0: i32) -> (i32, i32) {
    %c0_i32 = arith.constant 0 : i32
    %c0_i32_0 = arith.constant 0 : i32
    %c0_i32_1 = arith.constant 0 : i32
    return %c0_i32, %c0_i32_0 : i32, i32
  }
  func.func @transform_4(%arg0: i32) -> (i32, i32) {
    %c0_i32 = arith.constant 0 : i32
    %c0_i32_0 = arith.constant 0 : i32
    %c0_i32_1 = arith.constant 0 : i32
    return %c0_i32, %c0_i32_0 : i32, i32
  }
  func.func @transform_5(%arg0: i32) -> (i32, i32) {
    %c0_i32 = arith.constant 0 : i32
    %c0_i32_0 = arith.constant 0 : i32
    return %arg0, %c0_i32 : i32, i32
  }
}

</mosaic_0001>

<bundles_post_ra>
// kernel: vit_forward.13
= control target key start
LH: loop header
LB: loop body
LE: loop exit
PB: predicated region body
PF: predicated region fallthrough
CT: control target
= control target key end

     0   :  { %v191_v0 = vmov 0.0   ;;  %vm192_vm0 = vmmov 0   ;;  %s263_s1 = inlined_call_operand.vmem [shape: bf16[128,128], index: 1, kind: input, shape index: {}]   ;;  %s264_s0 = inlined_call_operand.vmem [shape: f32[10,128], index: 0, kind: input, shape index: {}]   ;;  %s265_s2 = inlined_call_operand.vmem [shape: f32[1,128], index: 2, kind: input, shape index: {}]   ;;  %s266_s3 = inlined_call_operand.vmem [shape: f32[10,128], index: 3, kind: input, shape index: {}]   ;;  %s267_s4 = inlined_call_operand.vmem [shape: f32[10,128], index: 4, kind: output, shape index: {}]  }
   0x1   :  { %161 = vmatprep.subr.bf16.mxu0 %v191_v0  ;;  %v183_v1 = vld [vmem:[%s263_s1] sm:$0xff]   ;;  %177 = vmatprep.mubr.msk.bf16.mxu0 %vm192_vm0, %v191_v0  ;;  %v184_v2 = vld [vmem:[%s263_s1 + $0x8] sm:$0xff]   ;;  %v185_v3 = vld [vmem:[%s263_s1 + $0x10] sm:$0xff]  }
   0x2   :  { %162 = vmatpush3.bf16.msra.mxu0 %v183_v1  ;;  %v186_v4 = vld [vmem:[%s263_s1 + $0x18] sm:$0xff]   ;;  %v187_v5 = vld [vmem:[%s263_s1 + $0x20] sm:$0xff]   ;;  %v188_v6 = vld [vmem:[%s263_s1 + $0x28] sm:$0xff]  }
   0x3   :  { %163 = vmatprep.subr.bf16.mxu0 %v191_v0  ;;  %v189_v7 = vld [vmem:[%s263_s1 + $0x30] sm:$0xff]   ;;  %v190_v8 = vld [vmem:[%s263_s1 + $0x38] sm:$0xff]   ;;  %v18_v9 = vld [vmem:[%s264_s0] sm:$0xff] }
   0x4   :  { %v19_v10 = vld [vmem:[%s264_s0 + $0x8] sm:$0x3]  ;;  %v143_v12 = vld [vmem:[%s265_s2] ss:$0 sm:$0xff] }
   0x5   :  { %v20_v11 = vpack.c.bf16 %v19_v10, %v18_v9  ;;  %v133_v14 = vld [vmem:[%s266_s3] sm:$0xff]  ;;  %v134_v18 = vld [vmem:[%s266_s3 + $0x8] sm:$0x3] }
   0x6   :  { %164 = vmatpush3.bf16.msra.mxu0 %v184_v2 }
   0x7   :  { %165 = vmatprep.subr.bf16.mxu0 %v191_v0 }
   0xa   :  { %166 = vmatpush3.bf16.msra.mxu0 %v185_v3 }
   0xb   :  { %167 = vmatprep.subr.bf16.mxu0 %v191_v0 }
   0xe   :  { %168 = vmatpush3.bf16.msra.mxu0 %v186_v4 }
   0xf   :  { %169 = vmatprep.subr.bf16.mxu0 %v191_v0 }
  0x12   :  { %170 = vmatpush3.bf16.msra.mxu0 %v187_v5 }
  0x13   :  { %171 = vmatprep.subr.bf16.mxu0 %v191_v0 }
  0x16   :  { %172 = vmatpush3.bf16.msra.mxu0 %v188_v6 }
  0x17   :  { %173 = vmatprep.subr.bf16.mxu0 %v191_v0 }
  0x1a   :  { %174 = vmatpush3.bf16.msra.mxu0 %v189_v7 }
  0x1b   :  { %175 = vmatprep.subr.bf16.mxu0 %v191_v0 }
  0x1e   :  { %176 = vmatpush3.bf16.msra.mxu0 %v190_v8 }
  0x21   :  { %178 = vmatmul.mubr.bf16.vlgmr.msra.gmra.mrb[0].mxu0 %v20_v11 }
  0xf4   :  { %v126_v13 = vpop.f32.mrb[0].mxu0 }
  0xf5   :  { %v127_v15 = vadd.f32 %v143_v12, %v126_v13  ;;  %v179_v16 = vpop.f32.mrb[1].mxu0 }
  0xf6   :  { %v129_v17 = vpop.f32.mrb[2].mxu0 }
  0xf7   :  { %v135_v19 = vadd.f32 %v133_v14, %v127_v15  ;;  %v130_v20 = vadd.f32 %v143_v12, %v129_v17  ;;  %v180_v21 = vpop.f32.mrb[3].mxu0 }
  0xf9   :  { %137 = vst [vmem:[%s267_s4] sm:$0xff] %v135_v19  ;;  %v136_v22 = vadd.f32 %v134_v18, %v130_v20 }
  0xfb   :  { %138 = vst [vmem:[%s267_s4 + $0x8] sm:$0x3] %v136_v22 }

// kernel: vit_forward.11
= control target key start
LH: loop header
LB: loop body
LE: loop exit
PB: predicated region body
PF: predicated region fallthrough
CT: control target
= control target key end

     0   :  { %vm27_vm0 = vcmask 1041408   ;;  %v433_v4 = vmov 0.0   ;;  %v434_v32 = vmov 0   ;;  %vm435_vm1 = vmmov 0   ;;  %s592_s0 = inlined_call_operand.vmem [shape: f32[10,128], index: 0, kind: input, shape index: {}]   ;;  %s593_s3 = inlined_call_operand.vmem [shape: bf16[128,384], index: 3, kind: input, shape index: {}]   ;;  %s594_s1 = inlined_call_operand.vmem [shape: f32[1,128], index: 1, kind: input, shape index: {}]   ;;  %s595_s2 = inlined_call_operand.vmem [shape: f32[1,128], index: 2, kind: input, shape index: {}]   ;;  %s596_s4 = inlined_call_operand.vmem [shape: f32[1,384], index: 4, kind: input, shape index: {}]   ;;  %s597_s5 = inlined_call_operand.vmem [shape: f32[10,384], index: 5, kind: output, shape index: {}]  }
   0x1   :  { %v22_v0 = vld [vmem:[%s592_s0 + $0x8] sm:$0x3]  ;;  %v21_v2 = vld [vmem:[%s592_s0] sm:$0xff]  ;;  %374 = vmatprep.subr.bf16.mxu1 %v433_v4  ;;  %v407_v20 = vld [vmem:[%s593_s3 + $0x30] ss:$12 sps:$4 sm:$0xff]   ;;  %277 = vmatprep.mubr.bf16.mxu0 %v434_v32  ;;  %v102_v55 = vlaneseq }
   0x2   :  { %v28_v1 = vsel %vm27_vm0, %v22_v0, 0.0  ;;  %v397_v3 = vld [vmem:[%s593_s3 + $0x4] ss:$12 sps:$4 sm:$0xff]   ;;  %v399_v5 = vld [vmem:[%s593_s3] ss:$12 sps:$4 sm:$0xff]   ;;  %390 = vmatprep.mubr.msk.bf16.mxu1 %vm435_vm1, %v433_v4 }
   0x3   :  { %29 = vadd.xlane.f32.xlu0 %v28_v1  ;;  %245 = vmatprep.subr.bf16.mxu0 %v397_v3  ;;  %v400_v6 = vld [vmem:[%s593_s3 + $0x8] ss:$12 sps:$4 sm:$0xff]   ;;  %v403_v17 = vld [vmem:[%s593_s3 + $0x18] ss:$12 sps:$4 sm:$0xff]   ;;  %v404_v18 = vld [vmem:[%s593_s3 + $0x20] ss:$12 sps:$4 sm:$0xff]  }
   0x4   :  { %246 = vmatpush1.bf16.msra.mxu0 %v399_v5  ;;  %v401_v7 = vld [vmem:[%s593_s3 + $0x1c] ss:$12 sps:$4 sm:$0xff]   ;;  %375 = vmatpush3.bf16.msra.mxu1 %v400_v6  ;;  %v405_v19 = vld [vmem:[%s593_s3 + $0x34] ss:$12 sps:$4 sm:$0xff]   ;;  %v408_v21 = vld [vmem:[%s593_s3 + $0x38] ss:$12 sps:$4 sm:$0xff]  }
   0x5   :  { %247 = vmatprep.subr.bf16.mxu0 %v401_v7  ;;  %376 = vmatprep.subr.bf16.mxu1 %v433_v4  ;;  %v409_v22 = vld [vmem:[%s593_s3 + $0x4c] ss:$12 sps:$4 sm:$0xff]   ;;  %v411_v23 = vld [vmem:[%s593_s3 + $0x48] ss:$12 sps:$4 sm:$0xff]   ;;  %v412_v24 = vld [vmem:[%s593_s3 + $0x50] ss:$12 sps:$4 sm:$0xff]  }
   0x6   :  { %v413_v25 = vld [vmem:[%s593_s3 + $0x64] ss:$12 sps:$4 sm:$0xff]   ;;  %v415_v26 = vld [vmem:[%s593_s3 + $0x60] ss:$12 sps:$4 sm:$0xff]   ;;  %v416_v27 = vld [vmem:[%s593_s3 + $0x68] ss:$12 sps:$4 sm:$0xff]  }
   0x7   :  { %25 = vadd.xlane.f32.xlu0 %v21_v2  ;;  %v417_v28 = vld [vmem:[%s593_s3 + $0x7c] ss:$12 sps:$4 sm:$0xff]   ;;  %v419_v29 = vld [vmem:[%s593_s3 + $0x78] ss:$12 sps:$4 sm:$0xff]   ;;  %v420_v30 = vld [vmem:[%s593_s3 + $0x80] ss:$12 sps:$4 sm:$0xff]  }
   0x8   :  { %248 = vmatpush1.bf16.msra.mxu0 %v403_v17  ;;  %377 = vmatpush3.bf16.msra.mxu1 %v404_v18  ;;  %v421_v31 = vld [vmem:[%s593_s3 + $0x94] ss:$12 sps:$4 sm:$0xff]   ;;  %v423_v33 = vld [vmem:[%s593_s3 + $0x90] ss:$12 sps:$4 sm:$0xff]   ;;  %v424_v34 = vld [vmem:[%s593_s3 + $0x98] ss:$12 sps:$4 sm:$0xff]  }
   0x9   :  { %378 = vmatprep.subr.bf16.mxu1 %v433_v4  ;;  %249 = vmatprep.subr.bf16.mxu0 %v405_v19  ;;  %v425_v35 = vld [vmem:[%s593_s3 + $0xac] ss:$12 sps:$4 sm:$0xff]   ;;  %v427_v36 = vld [vmem:[%s593_s3 + $0xa8] ss:$12 sps:$4 sm:$0xff]   ;;  %v428_v37 = vld [vmem:[%s593_s3 + $0xb0] ss:$12 sps:$4 sm:$0xff]  }
   0xa   :  { %v339_v46 = vld [vmem:[%s594_s1] ss:$0 sm:$0xff]  ;;  %v103_v56 = vshrl.u32 %v102_v55, 7 }
   0xb   :  { %v340_v50 = vld [vmem:[%s595_s2] ss:$0 sm:$0xff] }
   0xc   :  { %250 = vmatpush1.bf16.msra.mxu0 %v407_v20  ;;  %379 = vmatpush3.bf16.msra.mxu1 %v408_v21  ;;  %v104_v57 = vsub.s32 0, %v103_v56  ;;  %v112_v58 = vsub.s32 2, %v103_v56  ;;  %v100_v59 = vld [vmem:[%s596_s4] sm:$0x7]  ;;  %v108_v60 = vsub.s32 1, %v103_v56 }
   0xd   :  { %380 = vmatprep.subr.bf16.mxu1 %v433_v4  ;;  %251 = vmatprep.subr.bf16.mxu0 %v409_v22 }
   0xe   :  { %v105_v61 = vrot.slane %v100_v59, %v104_v57  ;;  %v113_v62 = vrot.slane %v100_v59, %v112_v58  ;;  %v109_v63 = vrot.slane %v100_v59, %v108_v60 }
  0x10   :  { %252 = vmatpush1.bf16.msra.mxu0 %v411_v23  ;;  %381 = vmatpush3.bf16.msra.mxu1 %v412_v24 }
  0x11   :  { %382 = vmatprep.subr.bf16.mxu1 %v433_v4  ;;  %253 = vmatprep.subr.bf16.mxu0 %v413_v25 }
  0x14   :  { %254 = vmatpush1.bf16.msra.mxu0 %v415_v26  ;;  %383 = vmatpush3.bf16.msra.mxu1 %v416_v27 }
  0x15   :  { %255 = vmatprep.subr.bf16.mxu0 %v417_v28  ;;  %384 = vmatprep.subr.bf16.mxu1 %v433_v4 }
  0x18   :  { %256 = vmatpush1.bf16.msra.mxu0 %v419_v29  ;;  %385 = vmatpush3.bf16.msra.mxu1 %v420_v30 }
  0x19   :  { %257 = vmatprep.subr.bf16.mxu0 %v421_v31  ;;  %386 = vmatprep.subr.bf16.mxu1 %v433_v4 }
  0x1c   :  { %258 = vmatpush1.bf16.msra.mxu0 %v423_v33  ;;  %387 = vmatpush3.bf16.msra.mxu1 %v424_v34 }
  0x1d   :  { %259 = vmatprep.subr.bf16.mxu0 %v425_v35  ;;  %388 = vmatprep.subr.bf16.mxu1 %v433_v4 }
  0x20   :  { %260 = vmatpush1.bf16.msra.mxu0 %v427_v36  ;;  %389 = vmatpush3.bf16.msra.mxu1 %v428_v37 }
  0x90   :  { %v30_v8 = vpop.xlane.xlu0 %29 }
  0x91   :  { %v33_v9 = vmul.f32 0.0078125, %v30_v8 }
  0x93   :  { %v487_v12 = vsub.f32 %v22_v0, %v33_v9 }
  0x94   :  { %v26_v10 = vpop.xlane.xlu0 %25 }
  0x95   :  { %v32_v11 = vmul.f32 0.0078125, %v26_v10  ;;  %v37_v15 = vmul.f32 %v487_v12, %v487_v12 }
  0x97   :  { %v489_v13 = vsub.f32 %v21_v2, %v32_v11  ;;  %v40_v16 = vsel %vm27_vm0, %v37_v15, 0.0 }
  0x99   :  { %v36_v14 = vmul.f32 %v489_v13, %v489_v13 }
  0x9b   :  { %38 = vadd.xlane.f32.xlu1 %v36_v14 }
  0x9f   :  { %41 = vadd.xlane.f32.xlu1 %v40_v16 }
 0x128   :  { %v39_v38 = vpop.xlane.xlu1 %38 }
 0x129   :  { %v43_v39 = vmul.f32 0.0078125, %v39_v38 }
 0x12b   :  { %v45_v40 = vadd.f32 1e-06, %v43_v39 }
 0x12c   :  { %v42_v41 = vpop.xlane.xlu1 %41 }
 0x12d   :  { %429 = vrsqrt.f32 %v45_v40  ;;  %v44_v42 = vmul.f32 0.0078125, %v42_v41 }
 0x12f   :  { %v46_v43 = vadd.f32 1e-06, %v44_v42 }
 0x131   :  { %431 = vrsqrt.f32 %v46_v43 }
 0x137   :  { %v430_v44 = vpop.eup %429 }
 0x138   :  { %v49_v45 = vmul.f32 %v430_v44, %v489_v13 }
 0x13a   :  { %v57_v49 = vmul.f32 %v339_v46, %v49_v45 }
 0x13b   :  { %v432_v47 = vpop.eup %431 }
 0x13c   :  { %v50_v48 = vmul.f32 %v432_v47, %v487_v12  ;;  %v65_v52 = vadd.f32 %v340_v50, %v57_v49 }
 0x13e   :  { %v58_v51 = vmul.f32 %v339_v46, %v50_v48 }
 0x140   :  { %v66_v53 = vadd.f32 %v340_v50, %v58_v51 }
 0x142   :  { %v67_v54 = vpack.c.bf16 %v66_v53, %v65_v52 }
 0x144   :  { %278 = vmatmul.mubr.bf16.vlgmr.msra.gmra.mrb[0].mxu0 %v67_v54  ;;  %391 = vmatmul.mubr.bf16.vlgmr.msra.gmra.mrb[0].mxu1 %v67_v54 }
 0x217   :  { %v279_v0 = vpop.f32.mrb[0].mxu0  ;;  %v322_v1 = vpop.f32.mrb[0].mxu1 }
 0x218   :  { %v280_v2 = vadd.f32 %v279_v0, %v105_v61  ;;  %v323_v3 = vadd.f32 %v322_v1, %v113_v62  ;;  %v281_v4 = vpop.f32.mrb[1].mxu0  ;;  %v392_v5 = vpop.f32.mrb[1].mxu1 }
 0x219   :  { %v282_v6 = vadd.f32 %v281_v4, %v109_v63  ;;  %v283_v7 = vpop.f32.mrb[2].mxu0  ;;  %v325_v8 = vpop.f32.mrb[2].mxu1 }
 0x21a   :  { %329 = vst [vmem:[%s597_s5] sm:$0xff] %v280_v2  ;;  %331 = vst [vmem:[%s597_s5 + $0x10] sm:$0xff] %v323_v3  ;;  %v284_v9 = vadd.f32 %v283_v7, %v105_v61  ;;  %v326_v10 = vadd.f32 %v325_v8, %v113_v62  ;;  %v285_v11 = vpop.f32.mrb[3].mxu0  ;;  %v393_v12 = vpop.f32.mrb[3].mxu1 }
 0x21b   :  { %330 = vst [vmem:[%s597_s5 + $0x8] sm:$0xff] %v282_v6  ;;  %v286_v13 = vadd.f32 %v285_v11, %v109_v63 }
 0x21c   :  { %332 = vst [vmem:[%s597_s5 + $0x18] sm:$0x3] %v284_v9  ;;  %334 = vst [vmem:[%s597_s5 + $0x28] sm:$0x3] %v326_v10 }
 0x21d   :  { %333 = vst [vmem:[%s597_s5 + $0x20] sm:$0x3] %v286_v13 }

// kernel: vit_forward.10
= control target key start
LH: loop header
LB: loop body
LE: loop exit
PB: predicated region body
PF: predicated region fallthrough
CT: control target
= control target key end

     0   :  { %s894_s1 = inlined_call_operand.vmem [shape: bf16[768,128], index: 1, kind: input, shape index: {}]   ;;  %s895_s0 = inlined_call_operand.vmem [shape: f32[8,768], index: 0, kind: input, shape index: {}]   ;;  %s896_s2 = inlined_call_operand.vmem [shape: f32[1,128], index: 2, kind: input, shape index: {}]   ;;  %s897_s3 = inlined_call_operand.vmem [shape: f32[8,128], index: 3, kind: output, shape index: {}]  }
   0x1   :  { %v658_v0 = vld [vmem:[%s894_s1 + $0x40] sm:$0xff]   ;;  %v662_v4 = vld [vmem:[%s894_s1 + $0x48] sm:$0xff]   ;;  %v666_v8 = vld [vmem:[%s894_s1 + $0x50] sm:$0xff]  }
   0x2   :  { %v659_v1 = vld [vmem:[%s894_s1] sm:$0xff]   ;;  %592 = vmatprep.subr.bf16.mxu0 %v658_v0  ;;  %v663_v5 = vld [vmem:[%s894_s1 + $0x8] sm:$0xff]   ;;  %v667_v9 = vld [vmem:[%s894_s1 + $0x10] sm:$0xff]  }
   0x3   :  { %v660_v2 = vld [vmem:[%s894_s1 + $0xc0] sm:$0xff]   ;;  %593 = vmatpush3.bf16.msra.mxu0 %v659_v1  ;;  %v664_v6 = vld [vmem:[%s894_s1 + $0xc8] sm:$0xff]   ;;  %v668_v10 = vld [vmem:[%s894_s1 + $0xd0] sm:$0xff]  }
   0x4   :  { %v661_v3 = vld [vmem:[%s894_s1 + $0x80] sm:$0xff]   ;;  %614 = vmatprep.subr.bf16.mxu1 %v660_v2  ;;  %594 = vmatprep.subr.bf16.mxu0 %v662_v4  ;;  %v665_v7 = vld [vmem:[%s894_s1 + $0x88] sm:$0xff]   ;;  %v669_v11 = vld [vmem:[%s894_s1 + $0x90] sm:$0xff]  }
   0x5   :  { %615 = vmatpush3.bf16.msra.mxu1 %v661_v3  ;;  %v670_v12 = vld [vmem:[%s894_s1 + $0x58] sm:$0xff]   ;;  %v674_v16 = vld [vmem:[%s894_s1 + $0x60] sm:$0xff]   ;;  %v678_v20 = vld [vmem:[%s894_s1 + $0x68] sm:$0xff]  }
   0x6   :  { %616 = vmatprep.subr.bf16.mxu1 %v664_v6  ;;  %v671_v13 = vld [vmem:[%s894_s1 + $0x18] sm:$0xff]   ;;  %v675_v17 = vld [vmem:[%s894_s1 + $0x20] sm:$0xff]   ;;  %v679_v21 = vld [vmem:[%s894_s1 + $0x28] sm:$0xff]  }
   0x7   :  { %595 = vmatpush3.bf16.msra.mxu0 %v663_v5  ;;  %v672_v14 = vld [vmem:[%s894_s1 + $0xd8] sm:$0xff]   ;;  %v676_v18 = vld [vmem:[%s894_s1 + $0xe0] sm:$0xff]   ;;  %v680_v22 = vld [vmem:[%s894_s1 + $0xe8] sm:$0xff]  }
   0x8   :  { %596 = vmatprep.subr.bf16.mxu0 %v666_v8  ;;  %v673_v15 = vld [vmem:[%s894_s1 + $0x98] sm:$0xff]   ;;  %v677_v19 = vld [vmem:[%s894_s1 + $0xa0] sm:$0xff]   ;;  %v681_v23 = vld [vmem:[%s894_s1 + $0xa8] sm:$0xff]  }
   0x9   :  { %617 = vmatpush3.bf16.msra.mxu1 %v665_v7  ;;  %v682_v24 = vld [vmem:[%s894_s1 + $0x70] sm:$0xff]   ;;  %v686_v28 = vld [vmem:[%s894_s1 + $0x78] sm:$0xff]   ;;  %v16_v31 = vld [vmem:[%s895_s0 + $0x8] sm:$0xff] }
   0xa   :  { %618 = vmatprep.subr.bf16.mxu1 %v668_v10  ;;  %v683_v25 = vld [vmem:[%s894_s1 + $0x30] sm:$0xff]   ;;  %v687_v29 = vld [vmem:[%s894_s1 + $0x38] sm:$0xff]   ;;  %v22_v32 = vpack.c.bf16 %v16_v31, %v16_v31  ;;  %v15_v34 = vld [vmem:[%s895_s0] sm:$0xff] }
   0xb   :  { %597 = vmatpush3.bf16.msra.mxu0 %v667_v9  ;;  %v684_v26 = vld [vmem:[%s894_s1 + $0xf0] sm:$0xff]   ;;  %v688_v30 = vld [vmem:[%s894_s1 + $0xf8] sm:$0xff]   ;;  %v21_v35 = vpack.c.bf16 %v15_v34, %v15_v34  ;;  %v690_v36 = vld [vmem:[%s894_s1 + $0x140] sm:$0xff]  }
   0xc   :  { %598 = vmatprep.subr.bf16.mxu0 %v670_v12  ;;  %v685_v27 = vld [vmem:[%s894_s1 + $0xb0] sm:$0xff]   ;;  %v689_v33 = vld [vmem:[%s894_s1 + $0xb8] sm:$0xff]   ;;  %450 = vmatprep.mubr.bf16.mxu0 %v22_v32  ;;  %v691_v39 = vld [vmem:[%s894_s1 + $0x100] sm:$0xff]  }
   0xd   :  { %619 = vmatpush3.bf16.msra.mxu1 %v669_v11  ;;  %v18_v37 = vld [vmem:[%s895_s0 + $0x18] sm:$0xff]  ;;  %v17_v40 = vld [vmem:[%s895_s0 + $0x10] sm:$0xff]  ;;  %v692_v42 = vld [vmem:[%s894_s1 + $0x148] sm:$0xff]  }
   0xe   :  { %620 = vmatprep.subr.bf16.mxu1 %v672_v14  ;;  %v24_v38 = vpack.c.bf16 %v18_v37, %v18_v37  ;;  %v23_v41 = vpack.c.bf16 %v17_v40, %v17_v40  ;;  %v693_v43 = vld [vmem:[%s894_s1 + $0x108] sm:$0xff]   ;;  %v694_v44 = vld [vmem:[%s894_s1 + $0x150] sm:$0xff]   ;;  %v696_v46 = vld [vmem:[%s894_s1 + $0x158] sm:$0xff]  }
   0xf   :  { %599 = vmatpush3.bf16.msra.mxu0 %v671_v13  ;;  %v695_v45 = vld [vmem:[%s894_s1 + $0x110] sm:$0xff]   ;;  %v697_v47 = vld [vmem:[%s894_s1 + $0x118] sm:$0xff]   ;;  %v698_v48 = vld [vmem:[%s894_s1 + $0x160] sm:$0xff]  }
  0x10   :  { %600 = vmatprep.subr.bf16.mxu0 %v674_v16  ;;  %490 = vmatprep.mubr.bf16.mxu1 %v24_v38  ;;  %v699_v49 = vld [vmem:[%s894_s1 + $0x120] sm:$0xff]   ;;  %v700_v50 = vld [vmem:[%s894_s1 + $0x168] sm:$0xff]   ;;  %v702_v54 = vld [vmem:[%s894_s1 + $0x170] sm:$0xff]  }
  0x11   :  { %621 = vmatpush3.bf16.msra.mxu1 %v673_v15  ;;  %v20_v51 = vld [vmem:[%s895_s0 + $0x28] sm:$0xff]  ;;  %v703_v55 = vld [vmem:[%s894_s1 + $0x130] sm:$0xff]   ;;  %v704_v56 = vld [vmem:[%s894_s1 + $0x178] sm:$0xff]  }
  0x12   :  { %622 = vmatprep.subr.bf16.mxu1 %v676_v18  ;;  %v26_v52 = vpack.c.bf16 %v20_v51, %v20_v51  ;;  %v701_v53 = vld [vmem:[%s894_s1 + $0x128] sm:$0xff]   ;;  %v705_v57 = vld [vmem:[%s894_s1 + $0x138] sm:$0xff]   ;;  %v19_v58 = vld [vmem:[%s895_s0 + $0x20] sm:$0xff] }
  0x13   :  { %601 = vmatpush3.bf16.msra.mxu0 %v675_v17  ;;  %v25_v59 = vpack.c.bf16 %v19_v58, %v19_v58  ;;  %v543_v61 = vld [vmem:[%s896_s2] ss:$0 sm:$0xff] }
  0x14   :  { %602 = vmatprep.subr.bf16.mxu0 %v678_v20 }
  0x15   :  { %623 = vmatpush3.bf16.msra.mxu1 %v677_v19 }
  0x16   :  { %624 = vmatprep.subr.bf16.mxu1 %v680_v22 }
  0x17   :  { %603 = vmatpush3.bf16.msra.mxu0 %v679_v21 }
  0x18   :  { %604 = vmatprep.subr.bf16.mxu0 %v682_v24 }
  0x19   :  { %625 = vmatpush3.bf16.msra.mxu1 %v681_v23 }
  0x1a   :  { %626 = vmatprep.subr.bf16.mxu1 %v684_v26 }
  0x1b   :  { %605 = vmatpush3.bf16.msra.mxu0 %v683_v25 }
  0x1c   :  { %606 = vmatprep.subr.bf16.mxu0 %v686_v28 }
  0x1d   :  { %627 = vmatpush3.bf16.msra.mxu1 %v685_v27 }
  0x1e   :  { %628 = vmatprep.subr.bf16.mxu1 %v688_v30 }
  0x1f   :  { %607 = vmatpush3.bf16.msra.mxu0 %v687_v29 }
  0x20   :  { %636 = vmatprep.subr.bf16.mxu0 %v690_v36 }
  0x21   :  { %629 = vmatpush3.bf16.msra.mxu1 %v689_v33 }
  0x22   :  { %451 = vmatmul.mubr.bf16.vlgmr.msra.gmra.mrb[0].mxu0 %v21_v35 }
  0x23   :  { %637 = vmatpush3.bf16.msra.mxu0 %v691_v39  ;;  %530 = vmatprep.mubr.bf16.mxu0 %v26_v52 }
  0x24   :  { %491 = vmatmul.mubr.bf16.vlgmr.msra.gmra.mrb[0].mxu1 %v23_v41  ;;  %638 = vmatprep.subr.bf16.mxu0 %v692_v42 }
  0x27   :  { %639 = vmatpush3.bf16.msra.mxu0 %v693_v43 }
  0x28   :  { %640 = vmatprep.subr.bf16.mxu0 %v694_v44 }
  0x2b   :  { %641 = vmatpush3.bf16.msra.mxu0 %v695_v45 }
  0x2c   :  { %642 = vmatprep.subr.bf16.mxu0 %v696_v46 }
  0x2f   :  { %643 = vmatpush3.bf16.msra.mxu0 %v697_v47 }
  0x30   :  { %644 = vmatprep.subr.bf16.mxu0 %v698_v48 }
  0x33   :  { %645 = vmatpush3.bf16.msra.mxu0 %v699_v49 }
  0x34   :  { %646 = vmatprep.subr.bf16.mxu0 %v700_v50 }
  0x37   :  { %647 = vmatpush3.bf16.msra.mxu0 %v701_v53 }
  0x38   :  { %648 = vmatprep.subr.bf16.mxu0 %v702_v54 }
  0x3b   :  { %649 = vmatpush3.bf16.msra.mxu0 %v703_v55 }
  0x3c   :  { %650 = vmatprep.subr.bf16.mxu0 %v704_v56 }
  0x3f   :  { %651 = vmatpush3.bf16.msra.mxu0 %v705_v57 }
  0x42   :  { %531 = vmatmul.mubr.bf16.vlgmr.msra.gmra.mrb[4].mxu0 %v25_v59 }
  0xf5   :  { %v608_v60 = vpop.f32.mrb[0].mxu0 }
  0xf6   :  { %v609_v62 = vpop.f32.mrb[1].mxu0 }
  0xf7   :  { %v610_v63 = vadd.f32 %v609_v62, %v608_v60  ;;  %v611_v0 = vpop.f32.mrb[2].mxu0  ;;  %v630_v1 = vpop.f32.mrb[0].mxu1 }
  0xf8   :  { %v612_v2 = vpop.f32.mrb[3].mxu0  ;;  %v631_v4 = vpop.f32.mrb[1].mxu1 }
  0xf9   :  { %v453_v3 = vadd.f32 %v610_v63, %v543_v61  ;;  %v632_v5 = vadd.f32 %v631_v4, %v630_v1  ;;  %v633_v6 = vpop.f32.mrb[2].mxu1 }
  0xfa   :  { %v634_v7 = vpop.f32.mrb[3].mxu1 }
  0xfb   :  { %v493_v8 = vadd.f32 %v632_v5, %v453_v3 }
 0x115   :  { %v652_v9 = vpop.f32.mrb[4].mxu0 }
 0x116   :  { %v653_v10 = vpop.f32.mrb[5].mxu0 }
 0x117   :  { %v654_v11 = vadd.f32 %v653_v10, %v652_v9  ;;  %v655_v12 = vpop.f32.mrb[6].mxu0 }
 0x118   :  { %v656_v13 = vpop.f32.mrb[7].mxu0 }
 0x119   :  { %v533_v14 = vadd.f32 %v654_v11, %v493_v8 }
 0x11b   :  { %538 = vst [vmem:[%s897_s3] sm:$0xff] %v533_v14 }

// kernel: vit_forward.12
= control target key start
LH: loop header
LB: loop body
LE: loop exit
PB: predicated region body
PF: predicated region fallthrough
CT: control target
= control target key end

     0   :  { %s777_s6 = smov 0   ;;  %s869_s0 = inlined_call_operand.vmem [shape: f32[2,5,384], index: 0, kind: input, shape index: {}]   ;;  %s870_s1 = inlined_call_operand.vmem [shape: f32[2,5,128], index: 1, kind: output, shape index: {}]  }
   0x1 LB: > { %s641_s7 = sadd.s32 4294967295, %s759_s6   ;;  %p645_p0 = scmp.ge.s32.totalorder %s759_s6, 1  ;;  %s759_s6 = sphi %s777_s6, %s11_s6  }
   0x2   : > { %p87_p1 = scmp.lt.s32.totalorder %s759_s6, 3 }
   0x4   : > { %p88_p2 = pnand %p645_p0, %p87_p1 }
   0x5   : > { %p106_p3 = scmp.lt.s32.totalorder (!%p88_p2), %s641_s7, 1  ;;  %v761_v0 = vmov (!%p88_p2), 0.0   ;;  %vm762_vm0 = vmmov (!%p88_p2), 0   ;;  %vm122_vm1 = vcmask (!%p88_p2), 261120   ;;  %s763_s12 = smov (!%p88_p2), 96   ;;  %vm170_vm2 = vcmask (!%p88_p2), 36864  }
   0x6   : > { %91 = sbr.rel (%p88_p2) target bundleno = 1168 (0x490), region = 24  ;;  %674 = vmatprep.subr.bf16.mxu0 (!%p88_p2), %v761_v0  ;;  %676 = vmatprep.mubr.msk.bf16.mxu0 (!%p88_p2), %vm762_vm0, %v761_v0  ;;  %s764_s13 = smov (!%p88_p2), 64   ;;  %vm186_vm3 = vcmask (!%p88_p2), 1041408   ;;  %vm187_vm4 = vcmask (!%p88_p2), 1042432   ;;  %v766_v14 = vmov (!%p88_p2), 65535   ;;  %vm182_vm5 = vcmask (!%p88_p2), 39936  }
   0x7   : > { %680 = vmatprep.subr.bf16.mxu1 (!%p88_p2), %v761_v0  ;;  %682 = vmatprep.mubr.msk.bf16.mxu1 (!%p88_p2), %vm762_vm0, %v761_v0  ;;  %s765_s14 = smov (!%p88_p2), 32   ;;  %v188_v15 = vsel (!%p88_p2), %vm186_vm3, 4294967295, %v766_v14  ;;  %vm583_vm6 = vcmask (!%p88_p2), 523264   ;;  %vm585_vm7 = vcmask (!%p88_p2), 785408  }
   0x8   : > { %v808_v16 = vsel (!%p88_p2), %vm187_vm4, %v188_v15, 0 }
   0xd   : > { %s872_s7 = smov (!%p106_p3, %s641_s7), 1 }
   0xe   : > { %s722_s8 = smul.u32 24, %s872_s7  ;;  %s647_s15 = sshll.u32 %s872_s7, 3 }
   0xf   : > { %s114_s18 = scalar_lea.vmem %s870_s1, %s647_s15 }
  0x10   : > { %s110_s11 = scalar_lea.vmem %s869_s0, %s722_s8 }
  0x11   : > { %v117_v1 = vld [vmem:[%s110_s11 + $0x8] sm:$0x1f]  ;;  %v116_v4 = vld [vmem:[%s110_s11] sm:$0x1f]  ;;  %v118_v12 = vld [vmem:[%s110_s11 + $0x10] sm:$0x1f] }
  0x12   : > { %v120_v2 = vpack.c.bf16 %v117_v1, %v117_v1  ;;  %v119_v5 = vpack.c.bf16 %v116_v4, %v116_v4  ;;  %v121_v13 = vpack.c.bf16 %v118_v12, %v118_v12 }
  0x14   : > { %v127_v3 = vsel %vm122_vm1, %v120_v2, 0  ;;  %235 = vrot.lane.b32.xlu1 %v119_v5, %s763_s12  ;;  %v191_v17 = vand.u32 %v808_v16, %v121_v13 }
  0x15   : > { %675 = vmatpush3.bf16.xpose.msra.mxu0 %v127_v3 }
  0x16   : > { %692 = vmatprep.subr.bf16.mxu0 %v761_v0  ;;  %681 = vmatpush3.bf16.msra.mxu1 %v191_v17 }
  0x17   : > { %686 = vmatprep.subr.bf16.mxu1 %v761_v0 }
  0x18   : > { %350 = vrot.lane.b32.xlu1 %v120_v2, %s764_s13 }
  0x1c   : > { %677 = vmatmul.mubr.msk.bf16.vlgmr.msra.gmra.mrb[0].mxu0 %vm122_vm1, %v119_v5  ;;  %348 = vrot.lane.b32.xlu1 %v119_v5, %s764_s13 }
  0x1d   : > { %694 = vmatprep.mubr.msk.bf16.mxu0 %vm762_vm0, %v761_v0 }
  0x20   : > { %461 = vrot.lane.b32.xlu1 %v120_v2, %s765_s14 }
  0x24   : > { %459 = vrot.lane.b32.xlu1 %v119_v5, %s765_s14 }
  0x86   : > { %v236_v23 = vpop.permute.xlu1 %235 }
  0x8a   : > { %v351_v26 = vpop.permute.xlu1 %350 }
  0x8b   : > { %v356_v27 = vsel %vm122_vm1, %v351_v26, 0 }
  0x8e   : > { %v349_v28 = vpop.permute.xlu1 %348 }
  0x92   : > { %v462_v29 = vpop.permute.xlu1 %461 }
  0x93   : > { %v467_v30 = vsel %vm122_vm1, %v462_v29, 0 }
  0x96   : > { %v460_v31 = vpop.permute.xlu1 %459 }
  0xef   : > { %v163_v6 = vpop.f32.mrb[0].mxu0 }
  0xf0   : > { %v169_v7 = vmul.f32 0.17677669, %v163_v6  ;;  %v678_v8 = vpop.f32.mrb[1].mxu0 }
  0xf1   : > { %v166_v9 = vpop.f32.mrb[2].mxu0 }
  0xf2   : > { %v679_v10 = vpop.f32.mrb[3].mxu0  ;;  %v171_v11 = vsel %vm170_vm2, %v169_v7, -inf }
  0xf3   : > { %172 = vmax.xlane.f32.xlu0 %v171_v11 }
 0x109   : > { %238 = vrot.lane.b32.xlu0 %v120_v2, %s763_s12 }
 0x180   : > { %v173_v18 = vpop.xlane.xlu0 %172 }
 0x181   : > { %v174_v19 = vsub.f32 %v169_v7, %v173_v18 }
 0x183   : > { %v175_v20 = vmul.f32 1.442695, %v174_v19 }
 0x184   : > { %v239_v21 = vpop.permute.xlu0 %238 }
 0x185   : > { %737 = vpow2.f32 %v175_v20  ;;  %v244_v24 = vsel %vm122_vm1, %v239_v21, 0 }
 0x18f   : > { %v813_v22 = vpop.eup %737 }
 0x190   : > { %v181_v25 = vpack.c.bf16 %v813_v22, %v813_v22  ;;  %v177_v15 = vsel %vm170_vm2, %v813_v22, 0.0 }
 0x192   : > { %683 = vmatmul.mubr.msk.bf16.vlgmr.msra.gmra.mrb[0].mxu1 %vm182_vm5, %v181_v25 }
 0x193   : > { %687 = vmatpush3.bf16.xpose.msra.mxu1 %v244_v24  ;;  %688 = vmatprep.mubr.msk.bf16.mxu1 %vm762_vm0, %v761_v0 }
 0x194   : > { %698 = vmatprep.subr.bf16.mxu1 %v761_v0 }
 0x19a   : > { %689 = vmatmul.mubr.msk.bf16.vlgmr.msra.gmra.mrb[4].mxu1 %vm122_vm1, %v236_v23 }
 0x19b   : > { %699 = vmatpush3.bf16.xpose.msra.mxu1 %v356_v27  ;;  %700 = vmatprep.mubr.msk.bf16.mxu1 %vm762_vm0, %v761_v0 }
 0x19c   : > { %710 = vmatprep.subr.bf16.mxu1 %v761_v0 }
 0x1a2   : > { %701 = vmatmul.mubr.msk.bf16.vlgmr.msra.gmra.mrb[8].mxu1 %vm122_vm1, %v349_v28 }
 0x1a3   : > { %711 = vmatpush3.bf16.xpose.msra.mxu1 %v467_v30  ;;  %712 = vmatprep.mubr.msk.bf16.mxu1 %vm762_vm0, %v761_v0 }
 0x1aa   : > { %713 = vmatmul.mubr.msk.bf16.vlgmr.msra.gmra.mrb[12].mxu1 %vm122_vm1, %v460_v31 }
 0x265   : > { %v832_v32 = vpop.f32.mrb[0].mxu1 }
 0x266   : > { %v684_v33 = vpop.f32.mrb[1].mxu1 }
 0x267   : > { %v230_v34 = vpop.f32.mrb[2].mxu1 }
 0x268   : > { %v685_v35 = vpop.f32.mrb[3].mxu1 }
 0x26d   : > { %v280_v36 = vpop.f32.mrb[4].mxu1 }
 0x26e   : > { %v286_v37 = vmul.f32 0.17677669, %v280_v36  ;;  %v690_v38 = vpop.f32.mrb[5].mxu1 }
 0x26f   : > { %v283_v39 = vpop.f32.mrb[6].mxu1 }
 0x270   : > { %v691_v40 = vpop.f32.mrb[7].mxu1  ;;  %v287_v41 = vsel %vm170_vm2, %v286_v37, -inf }
 0x271   : > { %288 = vmax.xlane.f32.xlu1 %v287_v41 }
 0x275   : > { %v392_v42 = vpop.f32.mrb[8].mxu1 }
 0x276   : > { %v398_v43 = vmul.f32 0.17677669, %v392_v42  ;;  %v702_v44 = vpop.f32.mrb[9].mxu1 }
 0x277   : > { %v395_v45 = vpop.f32.mrb[10].mxu1 }
 0x278   : > { %v399_v46 = vsel %vm170_vm2, %v398_v43, -inf  ;;  %v703_v47 = vpop.f32.mrb[11].mxu1 }
 0x279   : > { %400 = vmax.xlane.f32.xlu0 %v399_v46 }
 0x27d   : > { %v503_v48 = vpop.f32.mrb[12].mxu1 }
 0x27e   : > { %v714_v49 = vpop.f32.mrb[13].mxu1  ;;  %v509_v52 = vmul.f32 0.17677669, %v503_v48 }
 0x27f   : > { %v506_v50 = vpop.f32.mrb[14].mxu1 }
 0x280   : > { %v715_v51 = vpop.f32.mrb[15].mxu1  ;;  %v510_v53 = vsel %vm170_vm2, %v509_v52, -inf }
 0x282   : > { %410 = vrot.lane.b32.xlu1 %v121_v13, %s764_s13 }
 0x28f   : > { %299 = vrot.lane.b32.xlu0 %v121_v13, %s763_s12 }
 0x2a6   : > { %511 = vmax.xlane.f32.xlu1 %v510_v53 }
 0x2b7   : > { %521 = vrot.lane.b32.xlu1 %v121_v13, %s765_s14 }
 0x2fe   : > { %v289_v54 = vpop.xlane.xlu1 %288 }
 0x2ff   : > { %v290_v55 = vsub.f32 %v286_v37, %v289_v54 }
 0x301   : > { %v291_v56 = vmul.f32 1.442695, %v290_v55 }
 0x302   : > { %v411_v62 = vpop.permute.xlu1 %410 }
 0x303   : > { %739 = vpow2.f32 %v291_v56  ;;  %v416_v3 = vand.u32 %v411_v62, %v808_v16 }
 0x306   : > { %v401_v57 = vpop.xlane.xlu0 %400 }
 0x307   : > { %v402_v58 = vsub.f32 %v398_v43, %v401_v57 }
 0x309   : > { %v403_v59 = vmul.f32 1.442695, %v402_v58 }
 0x30a   : > { %v300_v60 = vpop.permute.xlu0 %299 }
 0x30b   : > { %741 = vpow2.f32 %v403_v59  ;;  %v305_v61 = vand.u32 %v300_v60, %v808_v16 }
 0x30d   : > { %v740_v63 = vpop.eup %739  ;;  %693 = vmatpush3.bf16.msra.mxu0 %v305_v61 }
 0x30e   : > { %v293_v1 = vsel %vm170_vm2, %v740_v63, 0.0  ;;  %v297_v2 = vpack.c.bf16 %v740_v63, %v740_v63  ;;  %704 = vmatprep.subr.bf16.mxu0 %v761_v0 }
 0x30f   : > { %294 = vadd.xlane.f32.xlu0 %v293_v1 }
 0x310   : > { %695 = vmatmul.mubr.msk.bf16.vlgmr.msra.gmra.mrb[4].mxu0 %vm182_vm5, %v297_v2 }
 0x311   : > { %705 = vmatpush3.bf16.msra.mxu0 %v416_v3  ;;  %706 = vmatprep.mubr.msk.bf16.mxu0 %vm762_vm0, %v761_v0 }
 0x312   : > { %716 = vmatprep.subr.bf16.mxu0 %v761_v0 }
 0x315   : > { %v742_v4 = vpop.eup %741 }
 0x316   : > { %v405_v5 = vsel %vm170_vm2, %v742_v4, 0.0  ;;  %v409_v6 = vpack.c.bf16 %v742_v4, %v742_v4 }
 0x317   : > { %406 = vadd.xlane.f32.xlu1 %v405_v5 }
 0x318   : > { %707 = vmatmul.mubr.msk.bf16.vlgmr.msra.gmra.mrb[8].mxu0 %vm182_vm5, %v409_v6 }
 0x319   : > { %718 = vmatprep.mubr.msk.bf16.mxu0 %vm762_vm0, %v761_v0 }
 0x333   : > { %v512_v7 = vpop.xlane.xlu1 %511 }
 0x334   : > { %v513_v8 = vsub.f32 %v509_v52, %v512_v7 }
 0x336   : > { %v514_v9 = vmul.f32 1.442695, %v513_v8 }
 0x337   : > { %v522_v10 = vpop.permute.xlu1 %521 }
 0x338   : > { %743 = vpow2.f32 %v514_v9  ;;  %v527_v11 = vand.u32 %v522_v10, %v808_v16 }
 0x33a   : > { %717 = vmatpush3.bf16.msra.mxu0 %v527_v11 }
 0x342   : > { %v744_v12 = vpop.eup %743 }
 0x343   : > { %v516_v13 = vsel %vm170_vm2, %v744_v12, 0.0  ;;  %v520_v14 = vpack.c.bf16 %v744_v12, %v744_v12 }
 0x344   : > { %517 = vadd.xlane.f32.xlu0 %v516_v13 }
 0x345   : > { %719 = vmatmul.mubr.msk.bf16.vlgmr.msra.gmra.mrb[12].mxu0 %vm182_vm5, %v520_v14 }
 0x348   : > { %178 = vadd.xlane.f32.xlu0 %v177_v15 }
 0x39c   : > { %v295_v0 = vpop.xlane.xlu0 %294 }
 0x39d   : > { %745 = vrcp.f32 %v295_v0 }
 0x3a4   : > { %v407_v17 = vpop.xlane.xlu1 %406 }
 0x3a5   : > { %747 = vrcp.f32 %v407_v17 }
 0x3a7   : > { %v746_v18 = vpop.eup %745 }
 0x3af   : > { %v748_v24 = vpop.eup %747 }
 0x3d1   : > { %v518_v29 = vpop.xlane.xlu0 %517 }
 0x3d2   : > { %749 = vrcp.f32 %v518_v29 }
 0x3d5   : > { %v179_v37 = vpop.xlane.xlu0 %178 }
 0x3d6   : > { %751 = vrcp.f32 %v179_v37 }
 0x3dc   : > { %v750_v30 = vpop.eup %749 }
 0x3e0   : > { %v752_v38 = vpop.eup %751 }
 0x3e1   : > { %v233_v40 = vmul.f32 %v752_v38, %v832_v32 }
 0x3e3   : > { %v341_v19 = vpop.f32.mrb[4].mxu0 }
 0x3e4   : > { %v347_v20 = vmul.f32 %v746_v18, %v341_v19  ;;  %v696_v16 = vpop.f32.mrb[5].mxu0 }
 0x3e5   : > { %v344_v21 = vpop.f32.mrb[6].mxu0 }
 0x3e6   : > { %571 = vrot.lane.b32.xlu1 %v347_v20, %s765_s14  ;;  %v697_v23 = vpop.f32.mrb[7].mxu0 }
 0x3eb   : > { %v452_v25 = vpop.f32.mrb[8].mxu0 }
 0x3ec   : > { %v458_v26 = vmul.f32 %v748_v24, %v452_v25  ;;  %v708_v27 = vpop.f32.mrb[9].mxu0 }
 0x3ed   : > { %v455_v28 = vpop.f32.mrb[10].mxu0 }
 0x3ee   : > { %575 = vrot.lane.b32.xlu0 %v458_v26, %s764_s13  ;;  %v709_v22 = vpop.f32.mrb[11].mxu0 }
 0x418   : > { %v563_v31 = vpop.f32.mrb[12].mxu0 }
 0x419   : > { %v569_v33 = vmul.f32 %v750_v30, %v563_v31  ;;  %v720_v34 = vpop.f32.mrb[13].mxu0 }
 0x41a   : > { %v566_v35 = vpop.f32.mrb[14].mxu0 }
 0x41b   : > { %579 = vrot.lane.b32.xlu1 %v569_v33, %s763_s12  ;;  %v721_v36 = vpop.f32.mrb[15].mxu0 }
 0x458   : > { %v572_v39 = vpop.permute.xlu1 %571 }
 0x459   : > { %v582_v42 = vsel %vm122_vm1, %v233_v40, %v572_v39 }
 0x460   : > { %v576_v41 = vpop.permute.xlu0 %575 }
 0x461   : > { %v584_v43 = vsel %vm583_vm6, %v582_v42, %v576_v41 }
 0x48d   : > { %v580_v44 = vpop.permute.xlu1 %579 }
 0x48e   : > { %v586_v45 = vsel %vm585_vm7, %v584_v43, %v580_v44 }
 0x48f   : > { %587 = vst [vmem:[%s114_s18] sm:$0x1f] %v586_v45 }
 0x490 PF: > { %s11_s6 = sadd.s32 1, %s759_s6  }
 0x491   : > { %p8_p4 = scmp.ge.s32.totalorder %s11_s6, 4  }
 0x493   :  { %10 = sbr.rel (!%p8_p4) target bundleno = 1 (0x1), region = 54 }

// kernel: vit_forward.19
= control target key start
LH: loop header
LB: loop body
LE: loop exit
PB: predicated region body
PF: predicated region fallthrough
CT: control target
= control target key end

     0   :  { %vm25_vm0 = vcmask 1041408   ;;  %s341_s0 = inlined_call_operand.vmem [shape: f32[2,128], index: 0, kind: input, shape index: {}]   ;;  %s342_s1 = inlined_call_operand.vmem [shape: f32[1,128], index: 1, kind: input, shape index: {}]   ;;  %s343_s2 = inlined_call_operand.vmem [shape: f32[1,128], index: 2, kind: input, shape index: {}]   ;;  %s344_s3 = inlined_call_operand.vmem [shape: bf16[128,128], index: 3, kind: input, shape index: {}]   ;;  %s345_s4 = inlined_call_operand.vmem [shape: f32[1,128], index: 4, kind: input, shape index: {}]   ;;  %s346_s5 = inlined_call_operand.hbm [shape: f32[2,128], index: 5, kind: output, shape index: {}]  }
   0x1   :  { %v22_v0 = vld [vmem:[%s341_s0] sm:$0x3] }
   0x2   :  { %v26_v1 = vsel %vm25_vm0, %v22_v0, 0.0 }
   0x3   :  { %27 = vadd.xlane.f32.xlu0 %v26_v1 }
   0x4   :  { %10 = vsyncpa [#allocation3], 0  ;;  %v224_v2 = vld [vmem:[%s344_s3] sm:$0xff]   ;;  %v258_v3 = vmov 0.0   ;;  %v225_v4 = vld [vmem:[%s344_s3 + $0x8] sm:$0xff]   ;;  %vm259_vm1 = vmmov 0  }
   0x5   :  { %201 = vmatprep.subr.bf16.mxu0 %v258_v3  ;;  %v226_v10 = vld [vmem:[%s344_s3 + $0x10] sm:$0xff]   ;;  %v227_v11 = vld [vmem:[%s344_s3 + $0x18] sm:$0xff]   ;;  %v228_v12 = vld [vmem:[%s344_s3 + $0x20] sm:$0xff]   ;;  %217 = vmatprep.mubr.msk.bf16.mxu0 %vm259_vm1, %v258_v3  ;;  %s260_s15 = smov [#allocation2]  }
   0x6   :  { %202 = vmatpush3.bf16.msra.mxu0 %v224_v2  ;;  %v229_v13 = vld [vmem:[%s344_s3 + $0x28] sm:$0xff]   ;;  %v230_v14 = vld [vmem:[%s344_s3 + $0x30] sm:$0xff]   ;;  %v231_v15 = vld [vmem:[%s344_s3 + $0x38] sm:$0xff]   ;;  %s173_s16 = sshll.u32 %s260_s15, 4  ;;  %s174_s16 = int_to_ptr.vmem [resolvable:$true] %s173_s16 }
   0x7   :  { %203 = vmatprep.subr.bf16.mxu0 %v258_v3  ;;  %v181_v20 = vld [vmem:[%s342_s1] ss:$0 sm:$0xff]  ;;  %s234_s1 = scalar_lea.vmem %s174_s16, 32  ;;  %p239_p1 = scmp.lt.s32.totalorder %s174_s16, %s174_s16 }
   0x8   :  { %v182_v22 = vld [vmem:[%s343_s2] ss:$0 sm:$0xff]  ;;  %p235_p0 = scmp.ne.s32.totalorder %s174_s16, %s234_s1  ;;  %p240_p2 = scmp.lt.s32.totalorder %s234_s1, %s234_s1 }
   0x9   :  { %v183_v26 = vld [vmem:[%s345_s4] ss:$0 sm:$0xff] }
   0xa   :  { %204 = vmatpush3.bf16.msra.mxu0 %v225_v4  ;;  %p241_p3 = por %p240_p2, %p239_p1 }
   0xb   :  { %205 = vmatprep.subr.bf16.mxu0 %v258_v3 }
   0xc   :  { %p242_p4 = pnand %p241_p3, %p235_p0 }
   0xe   :  { %206 = vmatpush3.bf16.msra.mxu0 %v226_v10 }
   0xf   :  { %207 = vmatprep.subr.bf16.mxu0 %v258_v3 }
  0x12   :  { %208 = vmatpush3.bf16.msra.mxu0 %v227_v11 }
  0x13   :  { %209 = vmatprep.subr.bf16.mxu0 %v258_v3 }
  0x16   :  { %210 = vmatpush3.bf16.msra.mxu0 %v228_v12 }
  0x17   :  { %211 = vmatprep.subr.bf16.mxu0 %v258_v3 }
  0x1a   :  { %212 = vmatpush3.bf16.msra.mxu0 %v229_v13 }
  0x1b   :  { %213 = vmatprep.subr.bf16.mxu0 %v258_v3 }
  0x1e   :  { %214 = vmatpush3.bf16.msra.mxu0 %v230_v14 }
  0x1f   :  { %215 = vmatprep.subr.bf16.mxu0 %v258_v3 }
  0x22   :  { %216 = vmatpush3.bf16.msra.mxu0 %v231_v15 }
  0x90   :  { %v28_v5 = vpop.xlane.xlu0 %27 }
  0x91   :  { %v30_v6 = vmul.f32 0.0078125, %v28_v5 }
  0x93   :  { %v31_v7 = vsub.f32 %v22_v0, %v30_v6 }
  0x95   :  { %v32_v8 = vmul.f32 %v31_v7, %v31_v7 }
  0x97   :  { %v33_v9 = vsel %vm25_vm0, %v32_v8, 0.0 }
  0x98   :  { %34 = vadd.xlane.f32.xlu0 %v33_v9 }
 0x125   :  { %v35_v16 = vpop.xlane.xlu0 %34 }
 0x126   :  { %v36_v17 = vmul.f32 0.0078125, %v35_v16 }
 0x128   :  { %v37_v18 = vadd.f32 1e-06, %v36_v17 }
 0x12a   :  { %232 = vrsqrt.f32 %v37_v18 }
 0x134   :  { %v233_v19 = vpop.eup %232 }
 0x135   :  { %v39_v21 = vmul.f32 %v233_v19, %v31_v7 }
 0x137   :  { %v46_v23 = vmul.f32 %v181_v20, %v39_v21 }
 0x139   :  { %v53_v24 = vadd.f32 %v182_v22, %v46_v23 }
 0x13b   :  { %v54_v25 = vpack.c.bf16 %v53_v24, %v53_v24 }
 0x13d   :  { %218 = vmatmul.mubr.bf16.vlgmr.msra.gmra.mrb[0].mxu0 %v54_v25 }
 0x210   :  { %v160_v27 = vpop.f32.mrb[0].mxu0 }
 0x211   :  { %v161_v28 = vadd.f32 %v183_v26, %v160_v27  ;;  %v219_v29 = vpop.f32.mrb[1].mxu0 }
 0x212   :  { %v163_v30 = vpop.f32.mrb[2].mxu0 }
 0x213   :  { %166 = vst [vmem:[#allocation2] sm:$0x3] %v161_v28  ;;  %v220_v31 = vpop.f32.mrb[3].mxu0 }
 0x214   :  { %245 = shalt.err (!%p242_p4)
}
 0x215   :  { %s246_s4 = scalar_lea.hbm %s346_s5, 32 }
 0x216   :  { %p247_p5 = scmp.ne.s32.totalorder %s346_s5, %s246_s4  ;;  %p250_p6 = scmp.lt.u32.totalorder %s246_s4, %s346_s5 }
 0x218   :  { %p252_p7 = pnand %p250_p6, %p247_p5 }
 0x21a   :  { %255 = shalt.err (!%p252_p7)
}
 0x21b   :  { %176 = dma.vmem_to_hbm [thread:$0]  %s174_s16, 32, %s346_s5, [#allocation3]  }
 0x21c   :  { %256 = dma.done.wait [#allocation3], 32  }
 0x21d   :  { %257 = vsyncadd [#allocation3], 4294967264 }
 0x21e   :  { %180 = vsyncpa [#allocation3], 1 }

// kernel: vit_forward.14
= control target key start
LH: loop header
LB: loop body
LE: loop exit
PB: predicated region body
PF: predicated region fallthrough
CT: control target
= control target key end

     0   :  { %vm33_vm0 = vcmask 1041408   ;;  %v638_v23 = vmov 0   ;;  %v92_v62 = vlaneseq  ;;  %s844_s0 = inlined_call_operand.vmem [shape: f32[10,128], index: 0, kind: input, shape index: {}]   ;;  %s845_s3 = inlined_call_operand.vmem [shape: bf16[128,256], index: 3, kind: input, shape index: {}]   ;;  %s846_s1 = inlined_call_operand.vmem [shape: f32[1,128], index: 1, kind: input, shape index: {}]   ;;  %s847_s2 = inlined_call_operand.vmem [shape: f32[1,128], index: 2, kind: input, shape index: {}]   ;;  %s848_s5 = inlined_call_operand.vmem [shape: bf16[256,128], index: 5, kind: input, shape index: {}]   ;;  %s849_s4 = inlined_call_operand.vmem [shape: f32[1,256], index: 4, kind: input, shape index: {}]   ;;  %s850_s6 = inlined_call_operand.vmem [shape: f32[1,128], index: 6, kind: input, shape index: {}]   ;;  %s851_s7 = inlined_call_operand.vmem [shape: f32[10,128], index: 7, kind: output, shape index: {}]  }
   0x1   :  { %v683_v0 = vld [vmem:[%s844_s0 + $0x8] sm:$0x3]  ;;  %v690_v2 = vld [vmem:[%s844_s0] sm:$0xff]  ;;  %v581_v5 = vld [vmem:[%s845_s3 + $0x14] ss:$8 sps:$4 sm:$0xff]   ;;  %214 = vmatprep.mubr.bf16.mxu0 %v638_v23 }
   0x2   :  { %v34_v1 = vsel %vm33_vm0, %v683_v0, 0.0  ;;  %v578_v3 = vld [vmem:[%s845_s3 + $0x4] ss:$8 sps:$4 sm:$0xff]   ;;  %v580_v4 = vld [vmem:[%s845_s3] ss:$8 sps:$4 sm:$0xff]   ;;  %v606_v50 = vld [vmem:[%s848_s5 + $0x50] sm:$0xff]  }
   0x3   :  { %35 = vadd.xlane.f32.xlu0 %v34_v1  ;;  %182 = vmatprep.subr.bf16.mxu0 %v578_v3  ;;  %v583_v15 = vld [vmem:[%s845_s3 + $0x10] ss:$8 sps:$4 sm:$0xff]   ;;  %v584_v16 = vld [vmem:[%s845_s3 + $0x24] ss:$8 sps:$4 sm:$0xff]   ;;  %v586_v17 = vld [vmem:[%s845_s3 + $0x20] ss:$8 sps:$4 sm:$0xff]  }
   0x4   :  { %183 = vmatpush1.bf16.msra.mxu0 %v580_v4  ;;  %v587_v18 = vld [vmem:[%s845_s3 + $0x34] ss:$8 sps:$4 sm:$0xff]   ;;  %v589_v19 = vld [vmem:[%s845_s3 + $0x30] ss:$8 sps:$4 sm:$0xff]   ;;  %v590_v20 = vld [vmem:[%s845_s3 + $0x44] ss:$8 sps:$4 sm:$0xff]  }
   0x5   :  { %184 = vmatprep.subr.bf16.mxu0 %v581_v5  ;;  %v592_v21 = vld [vmem:[%s845_s3 + $0x40] ss:$8 sps:$4 sm:$0xff]   ;;  %v593_v22 = vld [vmem:[%s845_s3 + $0x54] ss:$8 sps:$4 sm:$0xff]   ;;  %v595_v24 = vld [vmem:[%s845_s3 + $0x50] ss:$8 sps:$4 sm:$0xff]  }
   0x6   :  { %v596_v25 = vld [vmem:[%s845_s3 + $0x64] ss:$8 sps:$4 sm:$0xff]   ;;  %v598_v26 = vld [vmem:[%s845_s3 + $0x60] ss:$8 sps:$4 sm:$0xff]   ;;  %v599_v27 = vld [vmem:[%s845_s3 + $0x74] ss:$8 sps:$4 sm:$0xff]  }
   0x7   :  { %31 = vadd.xlane.f32.xlu0 %v690_v2  ;;  %v601_v28 = vld [vmem:[%s845_s3 + $0x70] ss:$8 sps:$4 sm:$0xff]   ;;  %v519_v37 = vld [vmem:[%s846_s1] ss:$0 sm:$0xff]  ;;  %v604_v48 = vld [vmem:[%s848_s5 + $0x48] sm:$0xff]   ;;  %v93_v63 = vshrl.u32 %v92_v62, 7 }
   0x8   :  { %185 = vmatpush1.bf16.msra.mxu0 %v583_v15  ;;  %v520_v41 = vld [vmem:[%s847_s2] ss:$0 sm:$0xff]  ;;  %v605_v49 = vld [vmem:[%s848_s5 + $0x8] sm:$0xff]   ;;  %v607_v51 = vld [vmem:[%s848_s5 + $0x10] sm:$0xff]  }
   0x9   :  { %186 = vmatprep.subr.bf16.mxu0 %v584_v16  ;;  %v602_v46 = vld [vmem:[%s848_s5 + $0x40] sm:$0xff]   ;;  %v608_v52 = vld [vmem:[%s848_s5 + $0x58] sm:$0xff]   ;;  %v612_v56 = vld [vmem:[%s848_s5 + $0x68] sm:$0xff]   ;;  %v94_v1 = vsub.s32 0, %v93_v63  ;;  %v98_v4 = vsub.s32 1, %v93_v63 }
   0xa   :  { %v603_v47 = vld [vmem:[%s848_s5] sm:$0xff]   ;;  %554 = vmatprep.subr.bf16.mxu1 %v602_v46  ;;  %v609_v53 = vld [vmem:[%s848_s5 + $0x18] sm:$0xff]   ;;  %v613_v57 = vld [vmem:[%s848_s5 + $0x28] sm:$0xff]  }
   0xb   :  { %555 = vmatpush3.bf16.msra.mxu1 %v603_v47  ;;  %v610_v54 = vld [vmem:[%s848_s5 + $0x60] sm:$0xff]   ;;  %v614_v58 = vld [vmem:[%s848_s5 + $0x70] sm:$0xff]   ;;  %v616_v60 = vld [vmem:[%s848_s5 + $0x78] sm:$0xff]  }
   0xc   :  { %187 = vmatpush1.bf16.msra.mxu0 %v586_v17  ;;  %556 = vmatprep.subr.bf16.mxu1 %v604_v48  ;;  %v611_v55 = vld [vmem:[%s848_s5 + $0x20] sm:$0xff]   ;;  %v615_v59 = vld [vmem:[%s848_s5 + $0x30] sm:$0xff]   ;;  %v617_v61 = vld [vmem:[%s848_s5 + $0x38] sm:$0xff]  }
   0xd   :  { %188 = vmatprep.subr.bf16.mxu0 %v587_v18  ;;  %v90_v3 = vld [vmem:[%s849_s4] sm:$0x3] }
   0xe   :  { %v95_v5 = vrot.slane %v90_v3, %v94_v1 }
   0xf   :  { %557 = vmatpush3.bf16.msra.mxu1 %v605_v49 }
  0x10   :  { %189 = vmatpush1.bf16.msra.mxu0 %v589_v19  ;;  %558 = vmatprep.subr.bf16.mxu1 %v606_v50 }
  0x11   :  { %190 = vmatprep.subr.bf16.mxu0 %v590_v20 }
  0x13   :  { %559 = vmatpush3.bf16.msra.mxu1 %v607_v51 }
  0x14   :  { %191 = vmatpush1.bf16.msra.mxu0 %v592_v21  ;;  %560 = vmatprep.subr.bf16.mxu1 %v608_v52 }
  0x15   :  { %192 = vmatprep.subr.bf16.mxu0 %v593_v22 }
  0x17   :  { %561 = vmatpush3.bf16.msra.mxu1 %v609_v53 }
  0x18   :  { %193 = vmatpush1.bf16.msra.mxu0 %v595_v24  ;;  %562 = vmatprep.subr.bf16.mxu1 %v610_v54 }
  0x19   :  { %194 = vmatprep.subr.bf16.mxu0 %v596_v25 }
  0x1b   :  { %563 = vmatpush3.bf16.msra.mxu1 %v611_v55 }
  0x1c   :  { %195 = vmatpush1.bf16.msra.mxu0 %v598_v26  ;;  %564 = vmatprep.subr.bf16.mxu1 %v612_v56 }
  0x1d   :  { %196 = vmatprep.subr.bf16.mxu0 %v599_v27 }
  0x1f   :  { %565 = vmatpush3.bf16.msra.mxu1 %v613_v57 }
  0x20   :  { %197 = vmatpush1.bf16.msra.mxu0 %v601_v28  ;;  %566 = vmatprep.subr.bf16.mxu1 %v614_v58 }
  0x23   :  { %567 = vmatpush3.bf16.msra.mxu1 %v615_v59 }
  0x24   :  { %568 = vmatprep.subr.bf16.mxu1 %v616_v60 }
  0x27   :  { %569 = vmatpush3.bf16.msra.mxu1 %v617_v61 }
  0x90   :  { %v36_v6 = vpop.xlane.xlu0 %35 }
  0x91   :  { %v39_v7 = vmul.f32 0.0078125, %v36_v6  ;;  %v99_v6 = vrot.slane %v90_v3, %v98_v4 }
  0x93   :  { %v41_v10 = vsub.f32 %v683_v0, %v39_v7 }
  0x94   :  { %v32_v8 = vpop.xlane.xlu0 %31 }
  0x95   :  { %v38_v9 = vmul.f32 0.0078125, %v32_v8  ;;  %v43_v13 = vmul.f32 %v41_v10, %v41_v10 }
  0x97   :  { %v40_v11 = vsub.f32 %v690_v2, %v38_v9  ;;  %v46_v14 = vsel %vm33_vm0, %v43_v13, 0.0 }
  0x99   :  { %v42_v12 = vmul.f32 %v40_v11, %v40_v11 }
  0x9b   :  { %44 = vadd.xlane.f32.xlu1 %v42_v12 }
  0x9f   :  { %47 = vadd.xlane.f32.xlu1 %v46_v14 }
 0x128   :  { %v45_v29 = vpop.xlane.xlu1 %44 }
 0x129   :  { %v49_v30 = vmul.f32 0.0078125, %v45_v29 }
 0x12b   :  { %v51_v31 = vadd.f32 1e-06, %v49_v30 }
 0x12c   :  { %v48_v32 = vpop.xlane.xlu1 %47 }
 0x12d   :  { %618 = vrsqrt.f32 %v51_v31  ;;  %v50_v33 = vmul.f32 0.0078125, %v48_v32 }
 0x12f   :  { %v52_v34 = vadd.f32 1e-06, %v50_v33 }
 0x131   :  { %620 = vrsqrt.f32 %v52_v34 }
 0x137   :  { %v619_v35 = vpop.eup %618 }
 0x138   :  { %v55_v36 = vmul.f32 %v619_v35, %v40_v11 }
 0x13a   :  { %v63_v40 = vmul.f32 %v519_v37, %v55_v36 }
 0x13b   :  { %v621_v38 = vpop.eup %620 }
 0x13c   :  { %v56_v39 = vmul.f32 %v621_v38, %v41_v10  ;;  %v71_v43 = vadd.f32 %v520_v41, %v63_v40 }
 0x13e   :  { %v64_v42 = vmul.f32 %v519_v37, %v56_v39 }
 0x140   :  { %v72_v44 = vadd.f32 %v520_v41, %v64_v42 }
 0x142   :  { %v73_v45 = vpack.c.bf16 %v72_v44, %v71_v43 }
 0x144   :  { %215 = vmatmul.mubr.bf16.vlgmr.msra.gmra.mrb[0].mxu0 %v73_v45 }
 0x217   :  { %v216_v7 = vpop.f32.mrb[0].mxu0 }
 0x218   :  { %v801_v8 = vadd.f32 %v216_v7, %v95_v5  ;;  %v218_v9 = vpop.f32.mrb[1].mxu0 }
 0x219   :  { %v803_v10 = vadd.f32 %v218_v9, %v99_v6  ;;  %v220_v11 = vpop.f32.mrb[2].mxu0 }
 0x21a   :  { %v806_v12 = vmul.f32 0.70710677, %v801_v8  ;;  %v808_v13 = vadd.f32 %v220_v11, %v95_v5  ;;  %v222_v14 = vpop.f32.mrb[3].mxu0 }
 0x21b   :  { %v811_v15 = vmul.f32 0.70710677, %v803_v10  ;;  %v813_v16 = vadd.f32 %v222_v14, %v99_v6 }
 0x21c   :  { %v241_v17 = vand.u32 2147483647, %v806_v12  ;;  %v817_v18 = vmul.f32 0.70710677, %v808_v13  ;;  %vm233_vm1 = vcmp.ge.f32.partialorder %v806_v12, 0.0 }
 0x21d   :  { %v242_v19 = vand.u32 2147483647, %v811_v15  ;;  %v822_v23 = vmul.f32 0.70710677, %v813_v16  ;;  %vm234_vm2 = vcmp.ge.f32.partialorder %v811_v15, 0.0 }
 0x21e   :  { %v245_v20 = vmul.f32 0.3275911, %v241_v17  ;;  %v243_v21 = vand.u32 2147483647, %v817_v18  ;;  %v297_v31 = vsub.f32 0.0, %v241_v17  ;;  %vm235_vm3 = vcmp.ge.f32.partialorder %v817_v18, 0.0 }
 0x21f   :  { %v246_v22 = vmul.f32 0.3275911, %v242_v19  ;;  %v244_v27 = vand.u32 2147483647, %v822_v23  ;;  %v298_v32 = vsub.f32 0.0, %v242_v19  ;;  %vm236_vm4 = vcmp.ge.f32.partialorder %v822_v23, 0.0 }
 0x220   :  { %v249_v24 = vadd.f32 1.0, %v245_v20  ;;  %v247_v25 = vmul.f32 0.3275911, %v243_v21  ;;  %v301_v34 = vmul.f32 %v297_v31, %v241_v17  ;;  %v299_v35 = vsub.f32 0.0, %v243_v21 }
 0x221   :  { %v250_v26 = vadd.f32 1.0, %v246_v22  ;;  %v248_v29 = vmul.f32 0.3275911, %v244_v27  ;;  %v302_v38 = vmul.f32 %v298_v32, %v242_v19  ;;  %v300_v39 = vsub.f32 0.0, %v244_v27 }
 0x222   :  { %622 = vrcp.f32 %v249_v24  ;;  %v251_v28 = vadd.f32 1.0, %v247_v25  ;;  %v305_v43 = vmul.f32 1.442695, %v301_v34  ;;  %v303_v44 = vmul.f32 %v299_v35, %v243_v21 }
 0x223   :  { %624 = vrcp.f32 %v250_v26  ;;  %v252_v30 = vadd.f32 1.0, %v248_v29  ;;  %v307_v47 = vmul.f32 1.442695, %v302_v38  ;;  %v304_v50 = vmul.f32 %v300_v39, %v244_v27 }
 0x224   :  { %626 = vrcp.f32 %v251_v28  ;;  %v309_v55 = vmul.f32 1.442695, %v303_v44  ;;  %v639_v35 = vmov -1.0   ;;  %v228_v23 = vmul.f32 0.5, %v813_v16 }
 0x225   :  { %628 = vrcp.f32 %v252_v30  ;;  %v311_v60 = vmul.f32 1.442695, %v304_v50  ;;  %v238_v12 = vsel %vm234_vm2, 1.0, %v639_v35  ;;  %v227_v50 = vmul.f32 0.5, %v808_v13  ;;  %v537_v13 = vld [vmem:[%s850_s6] ss:$0 sm:$0xff] }
 0x226   :  { %630 = vpow2.f32 %v305_v43 }
 0x227   :  { %632 = vpow2.f32 %v307_v47  ;;  %v225_v47 = vmul.f32 0.5, %v801_v8 }
 0x228   :  { %634 = vpow2.f32 %v309_v55 }
 0x229   :  { %636 = vpow2.f32 %v311_v60 }
 0x22c   :  { %v623_v33 = vpop.eup %622 }
 0x22d   :  { %v625_v36 = vpop.eup %624  ;;  %v261_v37 = vmul.f32 1.0614054, %v623_v33 }
 0x22e   :  { %v262_v40 = vmul.f32 1.0614054, %v625_v36  ;;  %v627_v42 = vpop.eup %626 }
 0x22f   :  { %v265_v41 = vadd.f32 -1.4531521, %v261_v37  ;;  %v263_v48 = vmul.f32 1.0614054, %v627_v42  ;;  %v629_v49 = vpop.eup %628  ;;  %v237_v37 = vsel %vm233_vm1, 1.0, %v639_v35 }
 0x230   :  { %v266_v45 = vadd.f32 -1.4531521, %v262_v40  ;;  %v264_v54 = vmul.f32 1.0614054, %v629_v49  ;;  %v631_v22 = vpop.eup %630 }
 0x231   :  { %v269_v46 = vmul.f32 %v623_v33, %v265_v41  ;;  %v267_v53 = vadd.f32 -1.4531521, %v263_v48  ;;  %v633_v25 = vpop.eup %632  ;;  %v240_v48 = vsel %vm236_vm4, 1.0, %v639_v35 }
 0x232   :  { %v270_v51 = vmul.f32 %v625_v36, %v266_v45  ;;  %v268_v59 = vadd.f32 -1.4531521, %v264_v54  ;;  %v635_v34 = vpop.eup %634  ;;  %v239_v45 = vsel %vm235_vm3, 1.0, %v639_v35 }
 0x233   :  { %v273_v52 = vadd.f32 1.4214138, %v269_v46  ;;  %v271_v58 = vmul.f32 %v627_v42, %v267_v53  ;;  %v637_v40 = vpop.eup %636 }
 0x234   :  { %v274_v56 = vadd.f32 1.4214138, %v270_v51  ;;  %v272_v1 = vmul.f32 %v629_v49, %v268_v59 }
 0x235   :  { %v277_v57 = vmul.f32 %v623_v33, %v273_v52  ;;  %v275_v63 = vadd.f32 1.4214138, %v271_v58 }
 0x236   :  { %v278_v61 = vmul.f32 %v625_v36, %v274_v56  ;;  %v276_v6 = vadd.f32 1.4214138, %v272_v1 }
 0x237   :  { %v281_v62 = vadd.f32 -0.28449672, %v277_v57  ;;  %v279_v5 = vmul.f32 %v627_v42, %v275_v63 }
 0x238   :  { %v282_v3 = vadd.f32 -0.28449672, %v278_v61  ;;  %v280_v14 = vmul.f32 %v629_v49, %v276_v6 }
 0x239   :  { %v285_v4 = vmul.f32 %v623_v33, %v281_v62  ;;  %v283_v11 = vadd.f32 -0.28449672, %v279_v5 }
 0x23a   :  { %v286_v7 = vmul.f32 %v625_v36, %v282_v3  ;;  %v284_v21 = vadd.f32 -0.28449672, %v280_v14 }
 0x23b   :  { %v289_v9 = vadd.f32 0.2548296, %v285_v4  ;;  %v287_v20 = vmul.f32 %v627_v42, %v283_v11 }
 0x23c   :  { %v290_v17 = vadd.f32 0.2548296, %v286_v7  ;;  %v288_v28 = vmul.f32 %v629_v49, %v284_v21 }
 0x23d   :  { %v293_v19 = vmul.f32 %v623_v33, %v289_v9  ;;  %v291_v27 = vadd.f32 0.2548296, %v287_v20 }
 0x23e   :  { %v294_v24 = vmul.f32 %v625_v36, %v290_v17  ;;  %v292_v32 = vadd.f32 0.2548296, %v288_v28 }
 0x23f   :  { %v313_v26 = vmul.f32 %v631_v22, %v293_v19  ;;  %v295_v31 = vmul.f32 %v627_v42, %v291_v27 }
 0x240   :  { %v314_v29 = vmul.f32 %v633_v25, %v294_v24  ;;  %v296_v39 = vmul.f32 %v629_v49, %v292_v32  ;;  %v226_v49 = vmul.f32 0.5, %v803_v10 }
 0x241   :  { %v317_v30 = vsub.f32 1.0, %v313_v26  ;;  %v315_v36 = vmul.f32 %v635_v34, %v295_v31 }
 0x242   :  { %v318_v33 = vsub.f32 1.0, %v314_v29  ;;  %v316_v43 = vmul.f32 %v637_v40, %v296_v39 }
 0x243   :  { %v321_v38 = vmul.f32 %v317_v30, %v237_v37  ;;  %v319_v41 = vsub.f32 1.0, %v315_v36 }
 0x244   :  { %v322_v44 = vmul.f32 %v318_v33, %v238_v12  ;;  %v320_v46 = vsub.f32 1.0, %v316_v43 }
 0x245   :  { %v325_v15 = vadd.f32 1.0, %v321_v38  ;;  %v323_v42 = vmul.f32 %v319_v41, %v239_v45 }
 0x246   :  { %v324_v18 = vmul.f32 %v320_v46, %v240_v48  ;;  %v326_v52 = vadd.f32 1.0, %v322_v44 }
 0x247   :  { %v327_v51 = vadd.f32 1.0, %v323_v42  ;;  %v329_v53 = vmul.f32 %v325_v15, %v225_v47 }
 0x248   :  { %v328_v55 = vadd.f32 1.0, %v324_v18  ;;  %v330_v56 = vmul.f32 %v326_v52, %v226_v49 }
 0x249   :  { %v331_v54 = vmul.f32 %v327_v51, %v227_v50 }
 0x24a   :  { %v332_v57 = vmul.f32 %v328_v55, %v228_v23 }
 0x24b   :  { %v333_v58 = vpack.c.bf16 %v331_v54, %v329_v53 }
 0x24c   :  { %v334_v59 = vpack.c.bf16 %v332_v57, %v330_v56 }
 0x24e   :  { %502 = vmatprep.mubr.bf16.mxu1 %v334_v59 }
 0x24f   :  { %503 = vmatmul.mubr.bf16.vlgmr.msra.gmra.mrb[0].mxu1 %v333_v58 }
 0x322   :  { %v570_v8 = vpop.f32.mrb[0].mxu1 }
 0x323   :  { %v571_v60 = vpop.f32.mrb[1].mxu1 }
 0x324   :  { %v572_v61 = vadd.f32 %v571_v60, %v570_v8  ;;  %v573_v62 = vpop.f32.mrb[2].mxu1 }
 0x325   :  { %v574_v10 = vpop.f32.mrb[3].mxu1 }
 0x326   :  { %v505_v63 = vadd.f32 %v572_v61, %v537_v13  ;;  %v575_v1 = vadd.f32 %v574_v10, %v573_v62 }
 0x328   :  { %v511_v16 = vadd.f32 %v505_v63, %v690_v2  ;;  %v508_v3 = vadd.f32 %v575_v1, %v537_v13 }
 0x32a   :  { %513 = vst [vmem:[%s851_s7] sm:$0xff] %v511_v16  ;;  %v512_v4 = vadd.f32 %v508_v3, %v683_v0 }
 0x32c   :  { %514 = vst [vmem:[%s851_s7 + $0x8] sm:$0x3] %v512_v4 }

</bundles_post_ra>
